<compile_context>
chip_gen: v6e
topology: v6e:2x2x1
jax: 0.10.0
libtpu: 0.0.40
codegen_flags: <defaults>
</compile_context>

<pallas_src>
import functools
import numpy as np

import jax
import jax.numpy as jnp
from jax.experimental import pallas as pl
from jax.experimental.pallas import tpu as pltpu


# ----------------------------------------------------------------------------
# Pallas kernel
# ----------------------------------------------------------------------------
def dss_kernel(alpha,
               # data
               x_ref, bp_ref, bpn_ref, ea_ref, ean_ref,
               gs_ref, gd_ref, dirw_ref,
               # fused phi weights: layer1 (wd multiplies Hd, ws multiplies Hs,
               # we multiplies edge_attr_norm, b1c bias), layer2 block-diag.
               wd_ref, ws_ref, we_ref, b1c_ref, w2b_ref, b2c_ref,
               # psi weights (whole, un-split)
               ps_w1, ps_b1, ps_w2, ps_b2,
               # decoder weights
               de_w1, de_b1, de_w2, de_b2,
               # outputs
               u_ref, res_ref, mse_ref, msed_ref):
    f32 = jnp.float32
    x = x_ref[...]          # [N, 1]
    bp = bp_ref[...]        # [N, 3]
    bpn = bpn_ref[...]      # [N, 3]
    ea = ea_ref[...]        # [E, 1]
    ean = ean_ref[...]      # [E, 1]
    Gs = gs_ref[...]        # [E, N] one-hot of src, self-loop rows zeroed
    Gd = gd_ref[...]        # [E, N] one-hot of dst, self-loop rows zeroed
    dirw = dirw_ref[...]    # [N, 1] dirichlet mask / dirichlet count

    gdt = Gs.dtype          # bf16 in perf mode, f32 in exact mode
    N = x.shape[0]
    K = de_w1.shape[0]
    L = de_w1.shape[1]

    # Build the transposed scatter matrices once in-kernel instead of shipping
    # extra [N,E] copies from HBM.
    GsT = Gs.T              # [N, E]
    GdT = Gd.T              # [N, E]

    B0 = bp[:, 0:1]
    B1 = bp[:, 1:2]
    B2 = bp[:, 2:3]
    # Hoisted step-invariant residual term: p1 = c0 + B1*U
    c0 = (1.0 - B1) * (-B0) - B1 * B2

    def dot(a, b):
        return jnp.dot(a, b, preferred_element_type=f32)

    def decoder(H, u):
        h = jnp.maximum(dot(H, de_w1[u]) + de_b1[u], 0.0)
        return dot(h, de_w2[u]) + de_b2[u]

    def write_mse(U, step):
        d = U - x
        mse_ref[step] = jnp.mean(d * d)
        msed_ref[step] = jnp.sum(d * d * dirw)

    H = jnp.zeros((N, L), dtype=f32)

    # step 0 : U['0'] = decoder_list[0](H0)   (U_init == 0)
    U = decoder(H, 0)
    u_ref[0] = U
    write_mse(U, 0)

    # K = 3 here: static unroll is fine.  (For large K, switch to
    # lax.fori_loop with dynamic weight indexing.)
    for u in range(K):
        # ---- fused gather of [H | U] at src and dst nodes -------------------
        CH = jnp.concatenate([H, U], axis=1).astype(gdt)     # [N, L+1]
        S = dot(Gs, CH)                                      # [E, L+1]
        D = dot(Gd, CH)                                      # [E, L+1]
        Hs, u_i = S[:, :L], S[:, L:]
        Hd, u_j = D[:, :L], D[:, L:]
        F_bar = ea * (u_j - u_i)                             # [E, 1]

        # ---- fused Phi_to / Phi_from ---------------------------------------
        # Phi_to : x_i = H[dst], x_j = H[src] ; Phi_from : x_i = H[src], x_j = H[dst]
        pre = (dot(Hd, wd_ref[u]) + dot(Hs, ws_ref[u])
               + ean * we_ref[u] + b1c_ref[u])               # [E, 2L]
        h = jnp.maximum(pre, 0.0)
        m = dot(h, w2b_ref[u]) + b2c_ref[u]                  # [E, 2L]  (m_to | m_from)

        # ---- scatters (self-loops removed via zeroed one-hot rows) ----------
        mess_to = dot(GdT, m[:, :L].astype(gdt))             # [N, L]
        src_payload = jnp.concatenate([m[:, L:], F_bar], axis=1).astype(gdt)
        SR = dot(GsT, src_payload)                           # [N, L+1]
        mess_from, F_sum = SR[:, :L], SR[:, L:]

        # residual loss for step u (uses U at step u)
        r = c0 + B1 * U + F_sum
        res_ref[u] = jnp.mean(r * r)

        # ---- Psi : single concat matmul --------------------------------------
        cat = jnp.concatenate([H, mess_to, mess_from, bpn], axis=1)   # [N, 3L+3]
        c = jnp.maximum(dot(cat, ps_w1[u]) + ps_b1[u], 0.0)
        H = H + alpha * (dot(c, ps_w2[u]) + ps_b2[u])

        U = decoder(H, u)           # decoder_list[update] in the torch code
        u_ref[u + 1] = U
        write_mse(U, u + 1)

    # residual loss for the final step K
    Ug = U.astype(gdt)
    u_i = dot(Gs, Ug)
    u_j = dot(Gd, Ug)
    F_bar = ea * (u_j - u_i)
    F_sum = dot(GsT, F_bar.astype(gdt))
    r = c0 + B1 * U + F_sum
    res_ref[K] = jnp.mean(r * r)


# ----------------------------------------------------------------------------
# Parameter init (deterministic, mimics nn.Linear default init)
# ----------------------------------------------------------------------------
def init_params(key, config):
    L, K = config['latent_dim'], config['k']

    def linear(k, fi, fo):
        k1, k2 = jax.random.split(k)
        bound = 1.0 / np.sqrt(fi)
        W = jax.random.uniform(k1, (fi, fo), jnp.float32, -bound, bound)
        b = jax.random.uniform(k2, (fo,), jnp.float32, -bound, bound)
        return W, b

    def stack_mlp(k, dims):
        Ws1, bs1, Ws2, bs2 = [], [], [], []
        for _ in range(K):
            k, k1, k2 = jax.random.split(k, 3)
            W1, b1 = linear(k1, dims[0], dims[1])
            W2, b2 = linear(k2, dims[1], dims[2])
            Ws1.append(W1); bs1.append(b1); Ws2.append(W2); bs2.append(b2)
        return (jnp.stack(Ws1), jnp.stack(bs1), jnp.stack(Ws2), jnp.stack(bs2))

    k1, k2, k3, k4 = jax.random.split(key, 4)
    return {
        'phi_to':   stack_mlp(k1, [2 * L + 1, L, L]),
        'phi_from': stack_mlp(k2, [2 * L + 1, L, L]),
        'psi':      stack_mlp(k3, [3 * L + 3, L, L]),
        'decoder':  stack_mlp(k4, [L, L, 1]),
    }


def _prep_params(params, L):
    """Fuse phi_to / phi_from weights; keep psi / decoder whole."""
    tW1, tb1, tW2, tb2 = params['phi_to']      # [K,2L+1,L], [K,L], [K,L,L], [K,L]
    fW1, fb1, fW2, fb2 = params['phi_from']
    pW1, pb1, pW2, pb2 = params['psi']
    dW1, db1, dW2, db2 = params['decoder']

    to_wi, to_wj, to_we = tW1[:, :L], tW1[:, L:2 * L], tW1[:, 2 * L:]
    fr_wi, fr_wj, fr_we = fW1[:, :L], fW1[:, L:2 * L], fW1[:, 2 * L:]

    wd = jnp.concatenate([to_wi, fr_wj], axis=-1)            # multiplies Hd  [K,L,2L]
    ws = jnp.concatenate([to_wj, fr_wi], axis=-1)            # multiplies Hs  [K,L,2L]
    we = jnp.concatenate([to_we, fr_we], axis=-1)            # [K,1,2L]
    b1c = jnp.concatenate([tb1, fb1], axis=-1)[:, None, :]   # [K,1,2L]
    z = jnp.zeros_like(tW2)
    w2b = jnp.concatenate([jnp.concatenate([tW2, z], axis=-1),
                           jnp.concatenate([z, fW2], axis=-1)], axis=1)  # [K,2L,2L]
    b2c = jnp.concatenate([tb2, fb2], axis=-1)[:, None, :]   # [K,1,2L]

    return ([wd, ws, we, b1c, w2b, b2c]
            + [pW1, pb1[:, None, :], pW2, pb2[:, None, :]]
            + [dW1, db1[:, None, :], dW2, db2[:, None, :]])


# ----------------------------------------------------------------------------
# Wrapper
# ----------------------------------------------------------------------------
def dss_forward(x, b_prime, b_prime_norm, edge_index, edge_attr, edge_attr_norm,
                params, config, onehot_dtype=jnp.bfloat16):
    N = x.shape[0]
    L, K = config['latent_dim'], config['k']
    alpha, gamma = config['alpha'], config['gamma']

    src, dst = edge_index[0], edge_index[1]
    nonself = (src != dst).astype(jnp.float32)[:, None]
    # One-hot gather/scatter matrices with self-loop rows zeroed: this folds
    # remove_self_loops into the matmuls (self-loop F_bar terms are 0 anyway).
    Gs = (jax.nn.one_hot(src, N, dtype=jnp.float32) * nonself).astype(onehot_dtype)
    Gd = (jax.nn.one_hot(dst, N, dtype=jnp.float32) * nonself).astype(onehot_dtype)

    dir_mask = (b_prime[:, 1] == 1).astype(jnp.float32)
    dir_count = jnp.maximum(jnp.sum(dir_mask), 1.0)
    dirw = (dir_mask / dir_count)[:, None]

    args = [x, b_prime, b_prime_norm, edge_attr, edge_attr_norm, Gs, Gd, dirw]
    args += _prep_params(params, L)

    kernel = functools.partial(dss_kernel, float(alpha))
    vmem = lambda: pl.BlockSpec(memory_space=pltpu.MemorySpace.VMEM)
    smem = lambda: pl.BlockSpec(memory_space=pltpu.MemorySpace.SMEM)

    # TODO(synk): for non-toy graphs, add an 'arbitrary' grid axis over edge
    # tiles (stream Gs/Gd via BlockSpec, accumulate mess_to/mess_from/F_sum in
    # VMEM scratch with pl.when init) and a core-parallel edge split on v7x.
    call = pl.pallas_call(
        kernel,
        out_shape=(
            jax.ShapeDtypeStruct((K + 1, N, 1), jnp.float32),  # U at every step
            jax.ShapeDtypeStruct((K + 1,), jnp.float32),       # residual loss
            jax.ShapeDtypeStruct((K + 1,), jnp.float32),       # mse loss
            jax.ShapeDtypeStruct((K + 1,), jnp.float32),       # mse dirichlet loss
        ),
        in_specs=[vmem() for _ in range(len(args))],
        out_specs=(vmem(), smem(), smem(), smem()),
        compiler_params=pltpu.CompilerParams(
            vmem_limit_bytes=48 * 1024 * 1024),
    )
    U_all, res, mse, msed = call(*args)

    gamma_w = jnp.array([gamma ** (K - u - 1) for u in range(K)], jnp.float32)
    total_loss = jnp.sum(res[1:] * gamma_w)
    return U_all, res, mse, msed, total_loss


# ----------------------------------------------------------------------------
# Pure-JAX reference (gather / scatter_add semantics, used as ground truth)
# ----------------------------------------------------------------------------
def dss_reference(x, b_prime, b_prime_norm, edge_index, edge_attr, edge_attr_norm,
                  params, config):
    N = x.shape[0]
    L, K = config['latent_dim'], config['k']
    alpha, gamma = config['alpha'], config['gamma']
    src, dst = edge_index[0], edge_index[1]
    nonself = (src != dst)[:, None].astype(jnp.float32)
    dir_idx = jnp.where(b_prime[:, 1] == 1)[0]

    def mlp(inp, W1, b1, W2, b2):
        return jnp.maximum(inp @ W1 + b1, 0.0) @ W2 + b2

    def residual(U):
        B0, B1, B2 = b_prime[:, 0:1], b_prime[:, 1:2], b_prime[:, 2:3]
        p1 = (1 - B1) * (-B0) + B1 * (U - B2)
        F_bar = edge_attr * (U[dst] - U[src])
        F_sum = jnp.zeros_like(U).at[src].add(F_bar)
        return jnp.mean((p1 + F_sum) ** 2)

    tW1, tb1, tW2, tb2 = params['phi_to']
    fW1, fb1, fW2, fb2 = params['phi_from']
    pW1, pb1, pW2, pb2 = params['psi']
    dW1, db1, dW2, db2 = params['decoder']

    H = jnp.zeros((N, L), jnp.float32)
    U = mlp(H, dW1[0], db1[0], dW2[0], db2[0]) + x * 0.0
    Us, res, mse, msed = [U], [residual(U)], [jnp.mean((U - x) ** 2)], \
        [jnp.mean((U[dir_idx] - x[dir_idx]) ** 2)]
    for u in range(K):
        cat_to = jnp.concatenate([H[dst], H[src], edge_attr_norm], axis=1)
        m_to = mlp(cat_to, tW1[u], tb1[u], tW2[u], tb2[u]) * nonself
        mess_to = jnp.zeros((N, L)).at[dst].add(m_to)
        cat_fr = jnp.concatenate([H[src], H[dst], edge_attr_norm], axis=1)
        m_fr = mlp(cat_fr, fW1[u], fb1[u], fW2[u], fb2[u]) * nonself
        mess_from = jnp.zeros((N, L)).at[src].add(m_fr)
        cat = jnp.concatenate([H, mess_to, mess_from, b_prime_norm], axis=1)
        H = H + alpha * mlp(cat, pW1[u], pb1[u], pW2[u], pb2[u])
        U = mlp(H, dW1[u], db1[u], dW2[u], db2[u])
        Us.append(U); res.append(residual(U))
        mse.append(jnp.mean((U - x) ** 2))
        msed.append(jnp.mean((U[dir_idx] - x[dir_idx]) ** 2))
    total = sum(res[u + 1] * gamma ** (K - u - 1) for u in range(K))
    return (jnp.stack(Us), jnp.stack(res), jnp.stack(mse), jnp.stack(msed), total)


# ----------------------------------------------------------------------------
if __name__ == "__main__":
    config = dict(latent_dim=16, k=3, alpha=0.1, gamma=0.9)
    N, E = 8, 24

    key = jax.random.PRNGKey(0)
    (k_src, k_dst, k_x, k_b0, k_b1, k_b2, k_bpn,
     k_ea, k_ean, k_w) = jax.random.split(key, 10)

    src = jax.random.randint(k_src, (E,), 0, N, dtype=jnp.int32)
    dst = jax.random.randint(k_dst, (E,), 0, N, dtype=jnp.int32)
    edge_index = jnp.stack([src, dst])

    x = jax.random.normal(k_x, (N, 1), jnp.float32)
    b_col1 = (jax.random.uniform(k_b1, (N,)) < 0.5).astype(jnp.float32).at[0].set(1.0)
    b_prime = jnp.stack([jax.random.normal(k_b0, (N,)),
                         b_col1,
                         jax.random.normal(k_b2, (N,))], axis=1).astype(jnp.float32)
    b_prime_norm = jax.random.normal(k_bpn, (N, 3), jnp.float32)
    edge_attr = jax.random.normal(k_ea, (E, 1), jnp.float32)
    edge_attr_norm = jax.random.normal(k_ean, (E, 1), jnp.float32)

    params = init_params(k_w, config)

    ref = dss_reference(x, b_prime, b_prime_norm, edge_index, edge_attr,
                        edge_attr_norm, params, config)

    # Exact mode (f32 one-hots): tight-ish check of the restructured kernel.
    out_f32 = dss_forward(x, b_prime, b_prime_norm, edge_index, edge_attr,
                          edge_attr_norm, params, config,
                          onehot_dtype=jnp.float32)
    jax.block_until_ready(out_f32)
    for got, want in zip(out_f32, ref):
        np.testing.assert_allclose(np.asarray(got), np.asarray(want),
                                   rtol=1e-2, atol=1e-4)

    # Perf mode (bf16 one-hot gather/scatter path): looser tolerance.
    out_bf16 = dss_forward(x, b_prime, b_prime_norm, edge_index, edge_attr,
                           edge_attr_norm, params, config,
                           onehot_dtype=jnp.bfloat16)
    jax.block_until_ready(out_bf16)
    for got, want in zip(out_bf16, ref):
        np.testing.assert_allclose(np.asarray(got), np.asarray(want),
                                   rtol=5e-2, atol=5e-3)

    print("KERNEL_OK")
</pallas_src>

<mosaic_0001>
module attributes {stable_mosaic.version = 11 : i64} {
  func.func @dss_kernel(%arg0: memref<8x1xf32, #tpu.memory_space<vmem>>, %arg1: memref<8x3xf32, #tpu.memory_space<vmem>>, %arg2: memref<8x3xf32, #tpu.memory_space<vmem>>, %arg3: memref<24x1xf32, #tpu.memory_space<vmem>>, %arg4: memref<24x1xf32, #tpu.memory_space<vmem>>, %arg5: memref<24x8xf32, #tpu.memory_space<vmem>>, %arg6: memref<24x8xf32, #tpu.memory_space<vmem>>, %arg7: memref<8x1xf32, #tpu.memory_space<vmem>>, %arg8: memref<3x16x32xf32, #tpu.memory_space<vmem>>, %arg9: memref<3x16x32xf32, #tpu.memory_space<vmem>>, %arg10: memref<3x1x32xf32, #tpu.memory_space<vmem>>, %arg11: memref<3x1x32xf32, #tpu.memory_space<vmem>>, %arg12: memref<3x32x32xf32, #tpu.memory_space<vmem>>, %arg13: memref<3x1x32xf32, #tpu.memory_space<vmem>>, %arg14: memref<3x51x16xf32, #tpu.memory_space<vmem>>, %arg15: memref<3x1x16xf32, #tpu.memory_space<vmem>>, %arg16: memref<3x16x16xf32, #tpu.memory_space<vmem>>, %arg17: memref<3x1x16xf32, #tpu.memory_space<vmem>>, %arg18: memref<3x16x16xf32, #tpu.memory_space<vmem>>, %arg19: memref<3x1x16xf32, #tpu.memory_space<vmem>>, %arg20: memref<3x16x1xf32, #tpu.memory_space<vmem>>, %arg21: memref<3x1x1xf32, #tpu.memory_space<vmem>>, %arg22: memref<4x8x1xf32, #tpu.memory_space<vmem>>, %arg23: memref<4xf32, #tpu.memory_space<smem>>, %arg24: memref<4xf32, #tpu.memory_space<smem>>, %arg25: memref<4xf32, #tpu.memory_space<smem>>) attributes {dimension_semantics = [], scalar_prefetch = 0 : i64, scratch_operands = 0 : i64, tpu.core_type = #tpu.core_type<tc>} {
    %c0 = arith.constant 0 : index
    %c0_0 = arith.constant 0 : index
    %0 = vector.load %arg0[%c0, %c0_0] : memref<8x1xf32, #tpu.memory_space<vmem>>, vector<8x1xf32>
    %c0_1 = arith.constant 0 : index
    %c0_2 = arith.constant 0 : index
    %1 = vector.load %arg1[%c0_1, %c0_2] : memref<8x3xf32, #tpu.memory_space<vmem>>, vector<8x3xf32>
    %c0_3 = arith.constant 0 : index
    %c0_4 = arith.constant 0 : index
    %2 = vector.load %arg2[%c0_3, %c0_4] : memref<8x3xf32, #tpu.memory_space<vmem>>, vector<8x3xf32>
    %c0_5 = arith.constant 0 : index
    %c0_6 = arith.constant 0 : index
    %3 = vector.load %arg3[%c0_5, %c0_6] : memref<24x1xf32, #tpu.memory_space<vmem>>, vector<24x1xf32>
    %c0_7 = arith.constant 0 : index
    %c0_8 = arith.constant 0 : index
    %4 = vector.load %arg4[%c0_7, %c0_8] : memref<24x1xf32, #tpu.memory_space<vmem>>, vector<24x1xf32>
    %c0_9 = arith.constant 0 : index
    %c0_10 = arith.constant 0 : index
    %5 = vector.load %arg5[%c0_9, %c0_10] : memref<24x8xf32, #tpu.memory_space<vmem>>, vector<24x8xf32>
    %c0_11 = arith.constant 0 : index
    %c0_12 = arith.constant 0 : index
    %6 = vector.load %arg6[%c0_11, %c0_12] : memref<24x8xf32, #tpu.memory_space<vmem>>, vector<24x8xf32>
    %c0_13 = arith.constant 0 : index
    %c0_14 = arith.constant 0 : index
    %7 = vector.load %arg7[%c0_13, %c0_14] : memref<8x1xf32, #tpu.memory_space<vmem>>, vector<8x1xf32>
    %8 = tpu.transpose %5, [1, 0] : vector<24x8xf32> -> vector<8x24xf32>
    %9 = tpu.transpose %6, [1, 0] : vector<24x8xf32> -> vector<8x24xf32>
    %10 = vector.extract_strided_slice %1 {offsets = [0, 0], sizes = [8, 1], strides = [1, 1]} : vector<8x3xf32> to vector<8x1xf32>
    %11 = vector.extract_strided_slice %1 {offsets = [0, 1], sizes = [8, 1], strides = [1, 1]} : vector<8x3xf32> to vector<8x1xf32>
    %12 = vector.extract_strided_slice %1 {offsets = [0, 2], sizes = [8, 1], strides = [1, 1]} : vector<8x3xf32> to vector<8x1xf32>
    %cst = arith.constant 1.000000e+00 : f32
    %13 = vector.broadcast %cst : f32 to vector<8x1xf32>
    %14 = arith.subf %13, %11 : vector<8x1xf32>
    %cst_15 = arith.constant 0.000000e+00 : f32
    %15 = vector.broadcast %cst_15 : f32 to vector<8x1xf32>
    %16 = arith.subf %15, %10 : vector<8x1xf32>
    %17 = arith.mulf %14, %16 : vector<8x1xf32>
    %18 = arith.mulf %11, %12 : vector<8x1xf32>
    %19 = arith.subf %17, %18 : vector<8x1xf32>
    %cst_16 = arith.constant 0.000000e+00 : f32
    %20 = vector.broadcast %cst_16 : f32 to vector<8x16xf32>
    %c0_17 = arith.constant 0 : index
    %c0_18 = arith.constant 0 : index
    %c0_19 = arith.constant 0 : index
    %21 = vector.load %arg18[%c0_17, %c0_18, %c0_19] : memref<3x16x16xf32, #tpu.memory_space<vmem>>, vector<1x16x16xf32>
    %22 = vector.shape_cast %21 : vector<1x16x16xf32> to vector<16x16xf32>
    %cst_20 = arith.constant dense<0.000000e+00> : vector<8x16xf32>
    %23 = tpu.matmul %20, %22, %cst_20 {dimension_numbers = #tpu.dot_dimension_numbers<[1], [0], [0], [1], [0, 0, 1, 1], [], []>} : vector<8x16xf32>, vector<16x16xf32>, vector<8x16xf32> -> vector<8x16xf32>
    %c0_21 = arith.constant 0 : index
    %c0_22 = arith.constant 0 : index
    %c0_23 = arith.constant 0 : index
    %24 = vector.load %arg19[%c0_21, %c0_22, %c0_23] : memref<3x1x16xf32, #tpu.memory_space<vmem>>, vector<1x1x16xf32>
    %25 = vector.shape_cast %24 : vector<1x1x16xf32> to vector<1x16xf32>
    %26 = vector.broadcast %25 : vector<1x16xf32> to vector<8x16xf32>
    %27 = arith.addf %23, %26 : vector<8x16xf32>
    %cst_24 = arith.constant 0.000000e+00 : f32
    %28 = vector.broadcast %cst_24 : f32 to vector<8x16xf32>
    %29 = arith.maximumf %27, %28 : vector<8x16xf32>
    %c0_25 = arith.constant 0 : index
    %c0_26 = arith.constant 0 : index
    %c0_27 = arith.constant 0 : index
    %30 = vector.load %arg20[%c0_25, %c0_26, %c0_27] : memref<3x16x1xf32, #tpu.memory_space<vmem>>, vector<1x16x1xf32>
    %31 = vector.shape_cast %30 : vector<1x16x1xf32> to vector<16x1xf32>
    %cst_28 = arith.constant dense<0.000000e+00> : vector<8x1xf32>
    %32 = tpu.matmul %29, %31, %cst_28 {dimension_numbers = #tpu.dot_dimension_numbers<[1], [0], [0], [1], [0, 0, 1, 1], [], []>} : vector<8x16xf32>, vector<16x1xf32>, vector<8x1xf32> -> vector<8x1xf32>
    %c0_29 = arith.constant 0 : index
    %c0_30 = arith.constant 0 : index
    %c0_31 = arith.constant 0 : index
    %33 = vector.load %arg21[%c0_29, %c0_30, %c0_31] : memref<3x1x1xf32, #tpu.memory_space<vmem>>, vector<1x1x1xf32>
    %34 = vector.shape_cast %33 : vector<1x1x1xf32> to vector<1x1xf32>
    %35 = vector.broadcast %34 : vector<1x1xf32> to vector<8x1xf32>
    %36 = arith.addf %32, %35 : vector<8x1xf32>
    %c0_32 = arith.constant 0 : index
    %c0_33 = arith.constant 0 : index
    %c0_34 = arith.constant 0 : index
    %37 = vector.load %arg22[%c0_32, %c0_33, %c0_34] : memref<4x8x1xf32, #tpu.memory_space<vmem>>, vector<1x8x1xf32>
    %38 = vector.shape_cast %37 : vector<1x8x1xf32> to vector<8x1xf32>
    %39 = vector.shape_cast %36 : vector<8x1xf32> to vector<1x8x1xf32>
    tpu.vector_store %arg22[%c0_32, %c0_33, %c0_34], %39 {strides = array<i32>} : memref<4x8x1xf32, #tpu.memory_space<vmem>>, vector<1x8x1xf32>,
    %40 = arith.subf %36, %0 : vector<8x1xf32>
    %41 = arith.mulf %40, %40 : vector<8x1xf32>
    %42 = vector.shape_cast %41 : vector<8x1xf32> to vector<1x8x1xf32>
    %cst_35 = arith.constant dense<0.000000e+00> : vector<1xf32>
    %43 = vector.multi_reduction <add>, %42, %cst_35 [1, 2] : vector<1x8x1xf32> to vector<1xf32>
    %44 = vector.shape_cast %43 : vector<1xf32> to vector<1x1x1xf32>
    %45 = vector.extract %44[0, 0, 0] : f32 from vector<1x1x1xf32>
    %cst_36 = arith.constant 8.000000e+00 : f32
    %46 = arith.divf %45, %cst_36 : f32
    %c0_37 = arith.constant 0 : index
    %47 = memref.load %arg24[%c0_37] : memref<4xf32, #tpu.memory_space<smem>>
    memref.store %46, %arg24[%c0_37] : memref<4xf32, #tpu.memory_space<smem>>
    %48 = arith.mulf %40, %40 : vector<8x1xf32>
    %49 = arith.mulf %48, %7 : vector<8x1xf32>
    %50 = vector.shape_cast %49 : vector<8x1xf32> to vector<1x8x1xf32>
    %cst_38 = arith.constant dense<0.000000e+00> : vector<1xf32>
    %51 = vector.multi_reduction <add>, %50, %cst_38 [1, 2] : vector<1x8x1xf32> to vector<1xf32>
    %52 = vector.shape_cast %51 : vector<1xf32> to vector<1x1x1xf32>
    %53 = vector.extract %52[0, 0, 0] : f32 from vector<1x1x1xf32>
    %c0_39 = arith.constant 0 : index
    %54 = memref.load %arg25[%c0_39] : memref<4xf32, #tpu.memory_space<smem>>
    memref.store %53, %arg25[%c0_39] : memref<4xf32, #tpu.memory_space<smem>>
    %55 = tpu.concatenate %20, %36 in 1 : vector<8x16xf32>, vector<8x1xf32> -> vector<8x17xf32>
    %cst_40 = arith.constant dense<0.000000e+00> : vector<24x17xf32>
    %56 = tpu.matmul %5, %55, %cst_40 {dimension_numbers = #tpu.dot_dimension_numbers<[1], [0], [0], [1], [0, 0, 1, 1], [], []>} : vector<24x8xf32>, vector<8x17xf32>, vector<24x17xf32> -> vector<24x17xf32>
    %cst_41 = arith.constant dense<0.000000e+00> : vector<24x17xf32>
    %57 = tpu.matmul %6, %55, %cst_41 {dimension_numbers = #tpu.dot_dimension_numbers<[1], [0], [0], [1], [0, 0, 1, 1], [], []>} : vector<24x8xf32>, vector<8x17xf32>, vector<24x17xf32> -> vector<24x17xf32>
    %58 = vector.extract_strided_slice %56 {offsets = [0, 0], sizes = [24, 16], strides = [1, 1]} : vector<24x17xf32> to vector<24x16xf32>
    %59 = vector.extract_strided_slice %56 {offsets = [0, 16], sizes = [24, 1], strides = [1, 1]} : vector<24x17xf32> to vector<24x1xf32>
    %60 = vector.extract_strided_slice %57 {offsets = [0, 0], sizes = [24, 16], strides = [1, 1]} : vector<24x17xf32> to vector<24x16xf32>
    %61 = vector.extract_strided_slice %57 {offsets = [0, 16], sizes = [24, 1], strides = [1, 1]} : vector<24x17xf32> to vector<24x1xf32>
    %62 = arith.subf %61, %59 : vector<24x1xf32>
    %63 = arith.mulf %3, %62 : vector<24x1xf32>
    %c0_42 = arith.constant 0 : index
    %c0_43 = arith.constant 0 : index
    %c0_44 = arith.constant 0 : index
    %64 = vector.load %arg8[%c0_42, %c0_43, %c0_44] : memref<3x16x32xf32, #tpu.memory_space<vmem>>, vector<1x16x32xf32>
    %65 = vector.shape_cast %64 : vector<1x16x32xf32> to vector<16x32xf32>
    %cst_45 = arith.constant dense<0.000000e+00> : vector<24x32xf32>
    %66 = tpu.matmul %60, %65, %cst_45 {dimension_numbers = #tpu.dot_dimension_numbers<[1], [0], [0], [1], [0, 0, 1, 1], [], []>} : vector<24x16xf32>, vector<16x32xf32>, vector<24x32xf32> -> vector<24x32xf32>
    %c0_46 = arith.constant 0 : index
    %c0_47 = arith.constant 0 : index
    %c0_48 = arith.constant 0 : index
    %67 = vector.load %arg9[%c0_46, %c0_47, %c0_48] : memref<3x16x32xf32, #tpu.memory_space<vmem>>, vector<1x16x32xf32>
    %68 = vector.shape_cast %67 : vector<1x16x32xf32> to vector<16x32xf32>
    %cst_49 = arith.constant dense<0.000000e+00> : vector<24x32xf32>
    %69 = tpu.matmul %58, %68, %cst_49 {dimension_numbers = #tpu.dot_dimension_numbers<[1], [0], [0], [1], [0, 0, 1, 1], [], []>} : vector<24x16xf32>, vector<16x32xf32>, vector<24x32xf32> -> vector<24x32xf32>
    %70 = arith.addf %66, %69 : vector<24x32xf32>
    %c0_50 = arith.constant 0 : index
    %c0_51 = arith.constant 0 : index
    %c0_52 = arith.constant 0 : index
    %71 = vector.load %arg10[%c0_50, %c0_51, %c0_52] : memref<3x1x32xf32, #tpu.memory_space<vmem>>, vector<1x1x32xf32>
    %72 = vector.shape_cast %71 : vector<1x1x32xf32> to vector<1x32xf32>
    %73 = vector.broadcast %4 : vector<24x1xf32> to vector<24x32xf32>
    %74 = vector.broadcast %72 : vector<1x32xf32> to vector<24x32xf32>
    %75 = arith.mulf %73, %74 : vector<24x32xf32>
    %76 = arith.addf %70, %75 : vector<24x32xf32>
    %c0_53 = arith.constant 0 : index
    %c0_54 = arith.constant 0 : index
    %c0_55 = arith.constant 0 : index
    %77 = vector.load %arg11[%c0_53, %c0_54, %c0_55] : memref<3x1x32xf32, #tpu.memory_space<vmem>>, vector<1x1x32xf32>
    %78 = vector.shape_cast %77 : vector<1x1x32xf32> to vector<1x32xf32>
    %79 = vector.broadcast %78 : vector<1x32xf32> to vector<24x32xf32>
    %80 = arith.addf %76, %79 : vector<24x32xf32>
    %cst_56 = arith.constant 0.000000e+00 : f32
    %81 = vector.broadcast %cst_56 : f32 to vector<24x32xf32>
    %82 = arith.maximumf %80, %81 : vector<24x32xf32>
    %c0_57 = arith.constant 0 : index
    %c0_58 = arith.constant 0 : index
    %c0_59 = arith.constant 0 : index
    %83 = vector.load %arg12[%c0_57, %c0_58, %c0_59] : memref<3x32x32xf32, #tpu.memory_space<vmem>>, vector<1x32x32xf32>
    %84 = vector.shape_cast %83 : vector<1x32x32xf32> to vector<32x32xf32>
    %cst_60 = arith.constant dense<0.000000e+00> : vector<24x32xf32>
    %85 = tpu.matmul %82, %84, %cst_60 {dimension_numbers = #tpu.dot_dimension_numbers<[1], [0], [0], [1], [0, 0, 1, 1], [], []>} : vector<24x32xf32>, vector<32x32xf32>, vector<24x32xf32> -> vector<24x32xf32>
    %c0_61 = arith.constant 0 : index
    %c0_62 = arith.constant 0 : index
    %c0_63 = arith.constant 0 : index
    %86 = vector.load %arg13[%c0_61, %c0_62, %c0_63] : memref<3x1x32xf32, #tpu.memory_space<vmem>>, vector<1x1x32xf32>
    %87 = vector.shape_cast %86 : vector<1x1x32xf32> to vector<1x32xf32>
    %88 = vector.broadcast %87 : vector<1x32xf32> to vector<24x32xf32>
    %89 = arith.addf %85, %88 : vector<24x32xf32>
    %90 = vector.extract_strided_slice %89 {offsets = [0, 0], sizes = [24, 16], strides = [1, 1]} : vector<24x32xf32> to vector<24x16xf32>
    %cst_64 = arith.constant dense<0.000000e+00> : vector<8x16xf32>
    %91 = tpu.matmul %9, %90, %cst_64 {dimension_numbers = #tpu.dot_dimension_numbers<[1], [0], [0], [1], [0, 0, 1, 1], [], []>} : vector<8x24xf32>, vector<24x16xf32>, vector<8x16xf32> -> vector<8x16xf32>
    %92 = vector.extract_strided_slice %89 {offsets = [0, 16], sizes = [24, 16], strides = [1, 1]} : vector<24x32xf32> to vector<24x16xf32>
    %93 = tpu.concatenate %92, %63 in 1 : vector<24x16xf32>, vector<24x1xf32> -> vector<24x17xf32>
    %cst_65 = arith.constant dense<0.000000e+00> : vector<8x17xf32>
    %94 = tpu.matmul %8, %93, %cst_65 {dimension_numbers = #tpu.dot_dimension_numbers<[1], [0], [0], [1], [0, 0, 1, 1], [], []>} : vector<8x24xf32>, vector<24x17xf32>, vector<8x17xf32> -> vector<8x17xf32>
    %95 = vector.extract_strided_slice %94 {offsets = [0, 0], sizes = [8, 16], strides = [1, 1]} : vector<8x17xf32> to vector<8x16xf32>
    %96 = vector.extract_strided_slice %94 {offsets = [0, 16], sizes = [8, 1], strides = [1, 1]} : vector<8x17xf32> to vector<8x1xf32>
    %97 = arith.mulf %11, %36 : vector<8x1xf32>
    %98 = arith.addf %19, %97 : vector<8x1xf32>
    %99 = arith.addf %98, %96 : vector<8x1xf32>
    %100 = arith.mulf %99, %99 : vector<8x1xf32>
    %101 = vector.shape_cast %100 : vector<8x1xf32> to vector<1x8x1xf32>
    %cst_66 = arith.constant dense<0.000000e+00> : vector<1xf32>
    %102 = vector.multi_reduction <add>, %101, %cst_66 [1, 2] : vector<1x8x1xf32> to vector<1xf32>
    %103 = vector.shape_cast %102 : vector<1xf32> to vector<1x1x1xf32>
    %104 = vector.extract %103[0, 0, 0] : f32 from vector<1x1x1xf32>
    %cst_67 = arith.constant 8.000000e+00 : f32
    %105 = arith.divf %104, %cst_67 : f32
    %c0_68 = arith.constant 0 : index
    %106 = memref.load %arg23[%c0_68] : memref<4xf32, #tpu.memory_space<smem>>
    memref.store %105, %arg23[%c0_68] : memref<4xf32, #tpu.memory_space<smem>>
    %107 = tpu.concatenate %20, %91, %95, %2 in 1 : vector<8x16xf32>, vector<8x16xf32>, vector<8x16xf32>, vector<8x3xf32> -> vector<8x51xf32>
    %c0_69 = arith.constant 0 : index
    %c0_70 = arith.constant 0 : index
    %c0_71 = arith.constant 0 : index
    %108 = vector.load %arg14[%c0_69, %c0_70, %c0_71] : memref<3x51x16xf32, #tpu.memory_space<vmem>>, vector<1x51x16xf32>
    %109 = vector.shape_cast %108 : vector<1x51x16xf32> to vector<51x16xf32>
    %cst_72 = arith.constant dense<0.000000e+00> : vector<8x16xf32>
    %110 = tpu.matmul %107, %109, %cst_72 {dimension_numbers = #tpu.dot_dimension_numbers<[1], [0], [0], [1], [0, 0, 1, 1], [], []>} : vector<8x51xf32>, vector<51x16xf32>, vector<8x16xf32> -> vector<8x16xf32>
    %c0_73 = arith.constant 0 : index
    %c0_74 = arith.constant 0 : index
    %c0_75 = arith.constant 0 : index
    %111 = vector.load %arg15[%c0_73, %c0_74, %c0_75] : memref<3x1x16xf32, #tpu.memory_space<vmem>>, vector<1x1x16xf32>
    %112 = vector.shape_cast %111 : vector<1x1x16xf32> to vector<1x16xf32>
    %113 = vector.broadcast %112 : vector<1x16xf32> to vector<8x16xf32>
    %114 = arith.addf %110, %113 : vector<8x16xf32>
    %cst_76 = arith.constant 0.000000e+00 : f32
    %115 = vector.broadcast %cst_76 : f32 to vector<8x16xf32>
    %116 = arith.maximumf %114, %115 : vector<8x16xf32>
    %c0_77 = arith.constant 0 : index
    %c0_78 = arith.constant 0 : index
    %c0_79 = arith.constant 0 : index
    %117 = vector.load %arg16[%c0_77, %c0_78, %c0_79] : memref<3x16x16xf32, #tpu.memory_space<vmem>>, vector<1x16x16xf32>
    %118 = vector.shape_cast %117 : vector<1x16x16xf32> to vector<16x16xf32>
    %cst_80 = arith.constant dense<0.000000e+00> : vector<8x16xf32>
    %119 = tpu.matmul %116, %118, %cst_80 {dimension_numbers = #tpu.dot_dimension_numbers<[1], [0], [0], [1], [0, 0, 1, 1], [], []>} : vector<8x16xf32>, vector<16x16xf32>, vector<8x16xf32> -> vector<8x16xf32>
    %c0_81 = arith.constant 0 : index
    %c0_82 = arith.constant 0 : index
    %c0_83 = arith.constant 0 : index
    %120 = vector.load %arg17[%c0_81, %c0_82, %c0_83] : memref<3x1x16xf32, #tpu.memory_space<vmem>>, vector<1x1x16xf32>
    %121 = vector.shape_cast %120 : vector<1x1x16xf32> to vector<1x16xf32>
    %122 = vector.broadcast %121 : vector<1x16xf32> to vector<8x16xf32>
    %123 = arith.addf %119, %122 : vector<8x16xf32>
    %cst_84 = arith.constant 1.000000e-01 : f32
    %124 = vector.broadcast %cst_84 : f32 to vector<8x16xf32>
    %125 = arith.mulf %124, %123 : vector<8x16xf32>
    %126 = arith.addf %20, %125 : vector<8x16xf32>
    %c0_85 = arith.constant 0 : index
    %c0_86 = arith.constant 0 : index
    %c0_87 = arith.constant 0 : index
    %127 = vector.load %arg18[%c0_85, %c0_86, %c0_87] : memref<3x16x16xf32, #tpu.memory_space<vmem>>, vector<1x16x16xf32>
    %128 = vector.shape_cast %127 : vector<1x16x16xf32> to vector<16x16xf32>
    %cst_88 = arith.constant dense<0.000000e+00> : vector<8x16xf32>
    %129 = tpu.matmul %126, %128, %cst_88 {dimension_numbers = #tpu.dot_dimension_numbers<[1], [0], [0], [1], [0, 0, 1, 1], [], []>} : vector<8x16xf32>, vector<16x16xf32>, vector<8x16xf32> -> vector<8x16xf32>
    %c0_89 = arith.constant 0 : index
    %c0_90 = arith.constant 0 : index
    %c0_91 = arith.constant 0 : index
    %130 = vector.load %arg19[%c0_89, %c0_90, %c0_91] : memref<3x1x16xf32, #tpu.memory_space<vmem>>, vector<1x1x16xf32>
    %131 = vector.shape_cast %130 : vector<1x1x16xf32> to vector<1x16xf32>
    %132 = vector.broadcast %131 : vector<1x16xf32> to vector<8x16xf32>
    %133 = arith.addf %129, %132 : vector<8x16xf32>
    %cst_92 = arith.constant 0.000000e+00 : f32
    %134 = vector.broadcast %cst_92 : f32 to vector<8x16xf32>
    %135 = arith.maximumf %133, %134 : vector<8x16xf32>
    %c0_93 = arith.constant 0 : index
    %c0_94 = arith.constant 0 : index
    %c0_95 = arith.constant 0 : index
    %136 = vector.load %arg20[%c0_93, %c0_94, %c0_95] : memref<3x16x1xf32, #tpu.memory_space<vmem>>, vector<1x16x1xf32>
    %137 = vector.shape_cast %136 : vector<1x16x1xf32> to vector<16x1xf32>
    %cst_96 = arith.constant dense<0.000000e+00> : vector<8x1xf32>
    %138 = tpu.matmul %135, %137, %cst_96 {dimension_numbers = #tpu.dot_dimension_numbers<[1], [0], [0], [1], [0, 0, 1, 1], [], []>} : vector<8x16xf32>, vector<16x1xf32>, vector<8x1xf32> -> vector<8x1xf32>
    %c0_97 = arith.constant 0 : index
    %c0_98 = arith.constant 0 : index
    %c0_99 = arith.constant 0 : index
    %139 = vector.load %arg21[%c0_97, %c0_98, %c0_99] : memref<3x1x1xf32, #tpu.memory_space<vmem>>, vector<1x1x1xf32>
    %140 = vector.shape_cast %139 : vector<1x1x1xf32> to vector<1x1xf32>
    %141 = vector.broadcast %140 : vector<1x1xf32> to vector<8x1xf32>
    %142 = arith.addf %138, %141 : vector<8x1xf32>
    %c1 = arith.constant 1 : index
    %c0_100 = arith.constant 0 : index
    %c0_101 = arith.constant 0 : index
    %143 = vector.load %arg22[%c1, %c0_100, %c0_101] : memref<4x8x1xf32, #tpu.memory_space<vmem>>, vector<1x8x1xf32>
    %144 = vector.shape_cast %143 : vector<1x8x1xf32> to vector<8x1xf32>
    %145 = vector.shape_cast %142 : vector<8x1xf32> to vector<1x8x1xf32>
    tpu.vector_store %arg22[%c1, %c0_100, %c0_101], %145 {strides = array<i32>} : memref<4x8x1xf32, #tpu.memory_space<vmem>>, vector<1x8x1xf32>,
    %146 = arith.subf %142, %0 : vector<8x1xf32>
    %147 = arith.mulf %146, %146 : vector<8x1xf32>
    %148 = vector.shape_cast %147 : vector<8x1xf32> to vector<1x8x1xf32>
    %cst_102 = arith.constant dense<0.000000e+00> : vector<1xf32>
    %149 = vector.multi_reduction <add>, %148, %cst_102 [1, 2] : vector<1x8x1xf32> to vector<1xf32>
    %150 = vector.shape_cast %149 : vector<1xf32> to vector<1x1x1xf32>
    %151 = vector.extract %150[0, 0, 0] : f32 from vector<1x1x1xf32>
    %cst_103 = arith.constant 8.000000e+00 : f32
    %152 = arith.divf %151, %cst_103 : f32
    %c1_104 = arith.constant 1 : index
    %153 = memref.load %arg24[%c1_104] : memref<4xf32, #tpu.memory_space<smem>>
    memref.store %152, %arg24[%c1_104] : memref<4xf32, #tpu.memory_space<smem>>
    %154 = arith.mulf %146, %146 : vector<8x1xf32>
    %155 = arith.mulf %154, %7 : vector<8x1xf32>
    %156 = vector.shape_cast %155 : vector<8x1xf32> to vector<1x8x1xf32>
    %cst_105 = arith.constant dense<0.000000e+00> : vector<1xf32>
    %157 = vector.multi_reduction <add>, %156, %cst_105 [1, 2] : vector<1x8x1xf32> to vector<1xf32>
    %158 = vector.shape_cast %157 : vector<1xf32> to vector<1x1x1xf32>
    %159 = vector.extract %158[0, 0, 0] : f32 from vector<1x1x1xf32>
    %c1_106 = arith.constant 1 : index
    %160 = memref.load %arg25[%c1_106] : memref<4xf32, #tpu.memory_space<smem>>
    memref.store %159, %arg25[%c1_106] : memref<4xf32, #tpu.memory_space<smem>>
    %161 = tpu.concatenate %126, %142 in 1 : vector<8x16xf32>, vector<8x1xf32> -> vector<8x17xf32>
    %cst_107 = arith.constant dense<0.000000e+00> : vector<24x17xf32>
    %162 = tpu.matmul %5, %161, %cst_107 {dimension_numbers = #tpu.dot_dimension_numbers<[1], [0], [0], [1], [0, 0, 1, 1], [], []>} : vector<24x8xf32>, vector<8x17xf32>, vector<24x17xf32> -> vector<24x17xf32>
    %cst_108 = arith.constant dense<0.000000e+00> : vector<24x17xf32>
    %163 = tpu.matmul %6, %161, %cst_108 {dimension_numbers = #tpu.dot_dimension_numbers<[1], [0], [0], [1], [0, 0, 1, 1], [], []>} : vector<24x8xf32>, vector<8x17xf32>, vector<24x17xf32> -> vector<24x17xf32>
    %164 = vector.extract_strided_slice %162 {offsets = [0, 0], sizes = [24, 16], strides = [1, 1]} : vector<24x17xf32> to vector<24x16xf32>
    %165 = vector.extract_strided_slice %162 {offsets = [0, 16], sizes = [24, 1], strides = [1, 1]} : vector<24x17xf32> to vector<24x1xf32>
    %166 = vector.extract_strided_slice %163 {offsets = [0, 0], sizes = [24, 16], strides = [1, 1]} : vector<24x17xf32> to vector<24x16xf32>
    %167 = vector.extract_strided_slice %163 {offsets = [0, 16], sizes = [24, 1], strides = [1, 1]} : vector<24x17xf32> to vector<24x1xf32>
    %168 = arith.subf %167, %165 : vector<24x1xf32>
    %169 = arith.mulf %3, %168 : vector<24x1xf32>
    %c1_109 = arith.constant 1 : index
    %c0_110 = arith.constant 0 : index
    %c0_111 = arith.constant 0 : index
    %170 = vector.load %arg8[%c1_109, %c0_110, %c0_111] : memref<3x16x32xf32, #tpu.memory_space<vmem>>, vector<1x16x32xf32>
    %171 = vector.shape_cast %170 : vector<1x16x32xf32> to vector<16x32xf32>
    %cst_112 = arith.constant dense<0.000000e+00> : vector<24x32xf32>
    %172 = tpu.matmul %166, %171, %cst_112 {dimension_numbers = #tpu.dot_dimension_numbers<[1], [0], [0], [1], [0, 0, 1, 1], [], []>} : vector<24x16xf32>, vector<16x32xf32>, vector<24x32xf32> -> vector<24x32xf32>
    %c1_113 = arith.constant 1 : index
    %c0_114 = arith.constant 0 : index
    %c0_115 = arith.constant 0 : index
    %173 = vector.load %arg9[%c1_113, %c0_114, %c0_115] : memref<3x16x32xf32, #tpu.memory_space<vmem>>, vector<1x16x32xf32>
    %174 = vector.shape_cast %173 : vector<1x16x32xf32> to vector<16x32xf32>
    %cst_116 = arith.constant dense<0.000000e+00> : vector<24x32xf32>
    %175 = tpu.matmul %164, %174, %cst_116 {dimension_numbers = #tpu.dot_dimension_numbers<[1], [0], [0], [1], [0, 0, 1, 1], [], []>} : vector<24x16xf32>, vector<16x32xf32>, vector<24x32xf32> -> vector<24x32xf32>
    %176 = arith.addf %172, %175 : vector<24x32xf32>
    %c1_117 = arith.constant 1 : index
    %c0_118 = arith.constant 0 : index
    %c0_119 = arith.constant 0 : index
    %177 = vector.load %arg10[%c1_117, %c0_118, %c0_119] : memref<3x1x32xf32, #tpu.memory_space<vmem>>, vector<1x1x32xf32>
    %178 = vector.shape_cast %177 : vector<1x1x32xf32> to vector<1x32xf32>
    %179 = vector.broadcast %4 : vector<24x1xf32> to vector<24x32xf32>
    %180 = vector.broadcast %178 : vector<1x32xf32> to vector<24x32xf32>
    %181 = arith.mulf %179, %180 : vector<24x32xf32>
    %182 = arith.addf %176, %181 : vector<24x32xf32>
    %c1_120 = arith.constant 1 : index
    %c0_121 = arith.constant 0 : index
    %c0_122 = arith.constant 0 : index
    %183 = vector.load %arg11[%c1_120, %c0_121, %c0_122] : memref<3x1x32xf32, #tpu.memory_space<vmem>>, vector<1x1x32xf32>
    %184 = vector.shape_cast %183 : vector<1x1x32xf32> to vector<1x32xf32>
    %185 = vector.broadcast %184 : vector<1x32xf32> to vector<24x32xf32>
    %186 = arith.addf %182, %185 : vector<24x32xf32>
    %cst_123 = arith.constant 0.000000e+00 : f32
    %187 = vector.broadcast %cst_123 : f32 to vector<24x32xf32>
    %188 = arith.maximumf %186, %187 : vector<24x32xf32>
    %c1_124 = arith.constant 1 : index
    %c0_125 = arith.constant 0 : index
    %c0_126 = arith.constant 0 : index
    %189 = vector.load %arg12[%c1_124, %c0_125, %c0_126] : memref<3x32x32xf32, #tpu.memory_space<vmem>>, vector<1x32x32xf32>
    %190 = vector.shape_cast %189 : vector<1x32x32xf32> to vector<32x32xf32>
    %cst_127 = arith.constant dense<0.000000e+00> : vector<24x32xf32>
    %191 = tpu.matmul %188, %190, %cst_127 {dimension_numbers = #tpu.dot_dimension_numbers<[1], [0], [0], [1], [0, 0, 1, 1], [], []>} : vector<24x32xf32>, vector<32x32xf32>, vector<24x32xf32> -> vector<24x32xf32>
    %c1_128 = arith.constant 1 : index
    %c0_129 = arith.constant 0 : index
    %c0_130 = arith.constant 0 : index
    %192 = vector.load %arg13[%c1_128, %c0_129, %c0_130] : memref<3x1x32xf32, #tpu.memory_space<vmem>>, vector<1x1x32xf32>
    %193 = vector.shape_cast %192 : vector<1x1x32xf32> to vector<1x32xf32>
    %194 = vector.broadcast %193 : vector<1x32xf32> to vector<24x32xf32>
    %195 = arith.addf %191, %194 : vector<24x32xf32>
    %196 = vector.extract_strided_slice %195 {offsets = [0, 0], sizes = [24, 16], strides = [1, 1]} : vector<24x32xf32> to vector<24x16xf32>
    %cst_131 = arith.constant dense<0.000000e+00> : vector<8x16xf32>
    %197 = tpu.matmul %9, %196, %cst_131 {dimension_numbers = #tpu.dot_dimension_numbers<[1], [0], [0], [1], [0, 0, 1, 1], [], []>} : vector<8x24xf32>, vector<24x16xf32>, vector<8x16xf32> -> vector<8x16xf32>
    %198 = vector.extract_strided_slice %195 {offsets = [0, 16], sizes = [24, 16], strides = [1, 1]} : vector<24x32xf32> to vector<24x16xf32>
    %199 = tpu.concatenate %198, %169 in 1 : vector<24x16xf32>, vector<24x1xf32> -> vector<24x17xf32>
    %cst_132 = arith.constant dense<0.000000e+00> : vector<8x17xf32>
    %200 = tpu.matmul %8, %199, %cst_132 {dimension_numbers = #tpu.dot_dimension_numbers<[1], [0], [0], [1], [0, 0, 1, 1], [], []>} : vector<8x24xf32>, vector<24x17xf32>, vector<8x17xf32> -> vector<8x17xf32>
    %201 = vector.extract_strided_slice %200 {offsets = [0, 0], sizes = [8, 16], strides = [1, 1]} : vector<8x17xf32> to vector<8x16xf32>
    %202 = vector.extract_strided_slice %200 {offsets = [0, 16], sizes = [8, 1], strides = [1, 1]} : vector<8x17xf32> to vector<8x1xf32>
    %203 = arith.mulf %11, %142 : vector<8x1xf32>
    %204 = arith.addf %19, %203 : vector<8x1xf32>
    %205 = arith.addf %204, %202 : vector<8x1xf32>
    %206 = arith.mulf %205, %205 : vector<8x1xf32>
    %207 = vector.shape_cast %206 : vector<8x1xf32> to vector<1x8x1xf32>
    %cst_133 = arith.constant dense<0.000000e+00> : vector<1xf32>
    %208 = vector.multi_reduction <add>, %207, %cst_133 [1, 2] : vector<1x8x1xf32> to vector<1xf32>
    %209 = vector.shape_cast %208 : vector<1xf32> to vector<1x1x1xf32>
    %210 = vector.extract %209[0, 0, 0] : f32 from vector<1x1x1xf32>
    %cst_134 = arith.constant 8.000000e+00 : f32
    %211 = arith.divf %210, %cst_134 : f32
    %c1_135 = arith.constant 1 : index
    %212 = memref.load %arg23[%c1_135] : memref<4xf32, #tpu.memory_space<smem>>
    memref.store %211, %arg23[%c1_135] : memref<4xf32, #tpu.memory_space<smem>>
    %213 = tpu.concatenate %126, %197, %201, %2 in 1 : vector<8x16xf32>, vector<8x16xf32>, vector<8x16xf32>, vector<8x3xf32> -> vector<8x51xf32>
    %c1_136 = arith.constant 1 : index
    %c0_137 = arith.constant 0 : index
    %c0_138 = arith.constant 0 : index
    %214 = vector.load %arg14[%c1_136, %c0_137, %c0_138] : memref<3x51x16xf32, #tpu.memory_space<vmem>>, vector<1x51x16xf32>
    %215 = vector.shape_cast %214 : vector<1x51x16xf32> to vector<51x16xf32>
    %cst_139 = arith.constant dense<0.000000e+00> : vector<8x16xf32>
    %216 = tpu.matmul %213, %215, %cst_139 {dimension_numbers = #tpu.dot_dimension_numbers<[1], [0], [0], [1], [0, 0, 1, 1], [], []>} : vector<8x51xf32>, vector<51x16xf32>, vector<8x16xf32> -> vector<8x16xf32>
    %c1_140 = arith.constant 1 : index
    %c0_141 = arith.constant 0 : index
    %c0_142 = arith.constant 0 : index
    %217 = vector.load %arg15[%c1_140, %c0_141, %c0_142] : memref<3x1x16xf32, #tpu.memory_space<vmem>>, vector<1x1x16xf32>
    %218 = vector.shape_cast %217 : vector<1x1x16xf32> to vector<1x16xf32>
    %219 = vector.broadcast %218 : vector<1x16xf32> to vector<8x16xf32>
    %220 = arith.addf %216, %219 : vector<8x16xf32>
    %cst_143 = arith.constant 0.000000e+00 : f32
    %221 = vector.broadcast %cst_143 : f32 to vector<8x16xf32>
    %222 = arith.maximumf %220, %221 : vector<8x16xf32>
    %c1_144 = arith.constant 1 : index
    %c0_145 = arith.constant 0 : index
    %c0_146 = arith.constant 0 : index
    %223 = vector.load %arg16[%c1_144, %c0_145, %c0_146] : memref<3x16x16xf32, #tpu.memory_space<vmem>>, vector<1x16x16xf32>
    %224 = vector.shape_cast %223 : vector<1x16x16xf32> to vector<16x16xf32>
    %cst_147 = arith.constant dense<0.000000e+00> : vector<8x16xf32>
    %225 = tpu.matmul %222, %224, %cst_147 {dimension_numbers = #tpu.dot_dimension_numbers<[1], [0], [0], [1], [0, 0, 1, 1], [], []>} : vector<8x16xf32>, vector<16x16xf32>, vector<8x16xf32> -> vector<8x16xf32>
    %c1_148 = arith.constant 1 : index
    %c0_149 = arith.constant 0 : index
    %c0_150 = arith.constant 0 : index
    %226 = vector.load %arg17[%c1_148, %c0_149, %c0_150] : memref<3x1x16xf32, #tpu.memory_space<vmem>>, vector<1x1x16xf32>
    %227 = vector.shape_cast %226 : vector<1x1x16xf32> to vector<1x16xf32>
    %228 = vector.broadcast %227 : vector<1x16xf32> to vector<8x16xf32>
    %229 = arith.addf %225, %228 : vector<8x16xf32>
    %cst_151 = arith.constant 1.000000e-01 : f32
    %230 = vector.broadcast %cst_151 : f32 to vector<8x16xf32>
    %231 = arith.mulf %230, %229 : vector<8x16xf32>
    %232 = arith.addf %126, %231 : vector<8x16xf32>
    %c1_152 = arith.constant 1 : index
    %c0_153 = arith.constant 0 : index
    %c0_154 = arith.constant 0 : index
    %233 = vector.load %arg18[%c1_152, %c0_153, %c0_154] : memref<3x16x16xf32, #tpu.memory_space<vmem>>, vector<1x16x16xf32>
    %234 = vector.shape_cast %233 : vector<1x16x16xf32> to vector<16x16xf32>
    %cst_155 = arith.constant dense<0.000000e+00> : vector<8x16xf32>
    %235 = tpu.matmul %232, %234, %cst_155 {dimension_numbers = #tpu.dot_dimension_numbers<[1], [0], [0], [1], [0, 0, 1, 1], [], []>} : vector<8x16xf32>, vector<16x16xf32>, vector<8x16xf32> -> vector<8x16xf32>
    %c1_156 = arith.constant 1 : index
    %c0_157 = arith.constant 0 : index
    %c0_158 = arith.constant 0 : index
    %236 = vector.load %arg19[%c1_156, %c0_157, %c0_158] : memref<3x1x16xf32, #tpu.memory_space<vmem>>, vector<1x1x16xf32>
    %237 = vector.shape_cast %236 : vector<1x1x16xf32> to vector<1x16xf32>
    %238 = vector.broadcast %237 : vector<1x16xf32> to vector<8x16xf32>
    %239 = arith.addf %235, %238 : vector<8x16xf32>
    %cst_159 = arith.constant 0.000000e+00 : f32
    %240 = vector.broadcast %cst_159 : f32 to vector<8x16xf32>
    %241 = arith.maximumf %239, %240 : vector<8x16xf32>
    %c1_160 = arith.constant 1 : index
    %c0_161 = arith.constant 0 : index
    %c0_162 = arith.constant 0 : index
    %242 = vector.load %arg20[%c1_160, %c0_161, %c0_162] : memref<3x16x1xf32, #tpu.memory_space<vmem>>, vector<1x16x1xf32>
    %243 = vector.shape_cast %242 : vector<1x16x1xf32> to vector<16x1xf32>
    %cst_163 = arith.constant dense<0.000000e+00> : vector<8x1xf32>
    %244 = tpu.matmul %241, %243, %cst_163 {dimension_numbers = #tpu.dot_dimension_numbers<[1], [0], [0], [1], [0, 0, 1, 1], [], []>} : vector<8x16xf32>, vector<16x1xf32>, vector<8x1xf32> -> vector<8x1xf32>
    %c1_164 = arith.constant 1 : index
    %c0_165 = arith.constant 0 : index
    %c0_166 = arith.constant 0 : index
    %245 = vector.load %arg21[%c1_164, %c0_165, %c0_166] : memref<3x1x1xf32, #tpu.memory_space<vmem>>, vector<1x1x1xf32>
    %246 = vector.shape_cast %245 : vector<1x1x1xf32> to vector<1x1xf32>
    %247 = vector.broadcast %246 : vector<1x1xf32> to vector<8x1xf32>
    %248 = arith.addf %244, %247 : vector<8x1xf32>
    %c2 = arith.constant 2 : index
    %c0_167 = arith.constant 0 : index
    %c0_168 = arith.constant 0 : index
    %249 = vector.load %arg22[%c2, %c0_167, %c0_168] : memref<4x8x1xf32, #tpu.memory_space<vmem>>, vector<1x8x1xf32>
    %250 = vector.shape_cast %249 : vector<1x8x1xf32> to vector<8x1xf32>
    %251 = vector.shape_cast %248 : vector<8x1xf32> to vector<1x8x1xf32>
    tpu.vector_store %arg22[%c2, %c0_167, %c0_168], %251 {strides = array<i32>} : memref<4x8x1xf32, #tpu.memory_space<vmem>>, vector<1x8x1xf32>,
    %252 = arith.subf %248, %0 : vector<8x1xf32>
    %253 = arith.mulf %252, %252 : vector<8x1xf32>
    %254 = vector.shape_cast %253 : vector<8x1xf32> to vector<1x8x1xf32>
    %cst_169 = arith.constant dense<0.000000e+00> : vector<1xf32>
    %255 = vector.multi_reduction <add>, %254, %cst_169 [1, 2] : vector<1x8x1xf32> to vector<1xf32>
    %256 = vector.shape_cast %255 : vector<1xf32> to vector<1x1x1xf32>
    %257 = vector.extract %256[0, 0, 0] : f32 from vector<1x1x1xf32>
    %cst_170 = arith.constant 8.000000e+00 : f32
    %258 = arith.divf %257, %cst_170 : f32
    %c2_171 = arith.constant 2 : index
    %259 = memref.load %arg24[%c2_171] : memref<4xf32, #tpu.memory_space<smem>>
    memref.store %258, %arg24[%c2_171] : memref<4xf32, #tpu.memory_space<smem>>
    %260 = arith.mulf %252, %252 : vector<8x1xf32>
    %261 = arith.mulf %260, %7 : vector<8x1xf32>
    %262 = vector.shape_cast %261 : vector<8x1xf32> to vector<1x8x1xf32>
    %cst_172 = arith.constant dense<0.000000e+00> : vector<1xf32>
    %263 = vector.multi_reduction <add>, %262, %cst_172 [1, 2] : vector<1x8x1xf32> to vector<1xf32>
    %264 = vector.shape_cast %263 : vector<1xf32> to vector<1x1x1xf32>
    %265 = vector.extract %264[0, 0, 0] : f32 from vector<1x1x1xf32>
    %c2_173 = arith.constant 2 : index
    %266 = memref.load %arg25[%c2_173] : memref<4xf32, #tpu.memory_space<smem>>
    memref.store %265, %arg25[%c2_173] : memref<4xf32, #tpu.memory_space<smem>>
    %267 = tpu.concatenate %232, %248 in 1 : vector<8x16xf32>, vector<8x1xf32> -> vector<8x17xf32>
    %cst_174 = arith.constant dense<0.000000e+00> : vector<24x17xf32>
    %268 = tpu.matmul %5, %267, %cst_174 {dimension_numbers = #tpu.dot_dimension_numbers<[1], [0], [0], [1], [0, 0, 1, 1], [], []>} : vector<24x8xf32>, vector<8x17xf32>, vector<24x17xf32> -> vector<24x17xf32>
    %cst_175 = arith.constant dense<0.000000e+00> : vector<24x17xf32>
    %269 = tpu.matmul %6, %267, %cst_175 {dimension_numbers = #tpu.dot_dimension_numbers<[1], [0], [0], [1], [0, 0, 1, 1], [], []>} : vector<24x8xf32>, vector<8x17xf32>, vector<24x17xf32> -> vector<24x17xf32>
    %270 = vector.extract_strided_slice %268 {offsets = [0, 0], sizes = [24, 16], strides = [1, 1]} : vector<24x17xf32> to vector<24x16xf32>
    %271 = vector.extract_strided_slice %268 {offsets = [0, 16], sizes = [24, 1], strides = [1, 1]} : vector<24x17xf32> to vector<24x1xf32>
    %272 = vector.extract_strided_slice %269 {offsets = [0, 0], sizes = [24, 16], strides = [1, 1]} : vector<24x17xf32> to vector<24x16xf32>
    %273 = vector.extract_strided_slice %269 {offsets = [0, 16], sizes = [24, 1], strides = [1, 1]} : vector<24x17xf32> to vector<24x1xf32>
    %274 = arith.subf %273, %271 : vector<24x1xf32>
    %275 = arith.mulf %3, %274 : vector<24x1xf32>
    %c2_176 = arith.constant 2 : index
    %c0_177 = arith.constant 0 : index
    %c0_178 = arith.constant 0 : index
    %276 = vector.load %arg8[%c2_176, %c0_177, %c0_178] : memref<3x16x32xf32, #tpu.memory_space<vmem>>, vector<1x16x32xf32>
    %277 = vector.shape_cast %276 : vector<1x16x32xf32> to vector<16x32xf32>
    %cst_179 = arith.constant dense<0.000000e+00> : vector<24x32xf32>
    %278 = tpu.matmul %272, %277, %cst_179 {dimension_numbers = #tpu.dot_dimension_numbers<[1], [0], [0], [1], [0, 0, 1, 1], [], []>} : vector<24x16xf32>, vector<16x32xf32>, vector<24x32xf32> -> vector<24x32xf32>
    %c2_180 = arith.constant 2 : index
    %c0_181 = arith.constant 0 : index
    %c0_182 = arith.constant 0 : index
    %279 = vector.load %arg9[%c2_180, %c0_181, %c0_182] : memref<3x16x32xf32, #tpu.memory_space<vmem>>, vector<1x16x32xf32>
    %280 = vector.shape_cast %279 : vector<1x16x32xf32> to vector<16x32xf32>
    %cst_183 = arith.constant dense<0.000000e+00> : vector<24x32xf32>
    %281 = tpu.matmul %270, %280, %cst_183 {dimension_numbers = #tpu.dot_dimension_numbers<[1], [0], [0], [1], [0, 0, 1, 1], [], []>} : vector<24x16xf32>, vector<16x32xf32>, vector<24x32xf32> -> vector<24x32xf32>
    %282 = arith.addf %278, %281 : vector<24x32xf32>
    %c2_184 = arith.constant 2 : index
    %c0_185 = arith.constant 0 : index
    %c0_186 = arith.constant 0 : index
    %283 = vector.load %arg10[%c2_184, %c0_185, %c0_186] : memref<3x1x32xf32, #tpu.memory_space<vmem>>, vector<1x1x32xf32>
    %284 = vector.shape_cast %283 : vector<1x1x32xf32> to vector<1x32xf32>
    %285 = vector.broadcast %4 : vector<24x1xf32> to vector<24x32xf32>
    %286 = vector.broadcast %284 : vector<1x32xf32> to vector<24x32xf32>
    %287 = arith.mulf %285, %286 : vector<24x32xf32>
    %288 = arith.addf %282, %287 : vector<24x32xf32>
    %c2_187 = arith.constant 2 : index
    %c0_188 = arith.constant 0 : index
    %c0_189 = arith.constant 0 : index
    %289 = vector.load %arg11[%c2_187, %c0_188, %c0_189] : memref<3x1x32xf32, #tpu.memory_space<vmem>>, vector<1x1x32xf32>
    %290 = vector.shape_cast %289 : vector<1x1x32xf32> to vector<1x32xf32>
    %291 = vector.broadcast %290 : vector<1x32xf32> to vector<24x32xf32>
    %292 = arith.addf %288, %291 : vector<24x32xf32>
    %cst_190 = arith.constant 0.000000e+00 : f32
    %293 = vector.broadcast %cst_190 : f32 to vector<24x32xf32>
    %294 = arith.maximumf %292, %293 : vector<24x32xf32>
    %c2_191 = arith.constant 2 : index
    %c0_192 = arith.constant 0 : index
    %c0_193 = arith.constant 0 : index
    %295 = vector.load %arg12[%c2_191, %c0_192, %c0_193] : memref<3x32x32xf32, #tpu.memory_space<vmem>>, vector<1x32x32xf32>
    %296 = vector.shape_cast %295 : vector<1x32x32xf32> to vector<32x32xf32>
    %cst_194 = arith.constant dense<0.000000e+00> : vector<24x32xf32>
    %297 = tpu.matmul %294, %296, %cst_194 {dimension_numbers = #tpu.dot_dimension_numbers<[1], [0], [0], [1], [0, 0, 1, 1], [], []>} : vector<24x32xf32>, vector<32x32xf32>, vector<24x32xf32> -> vector<24x32xf32>
    %c2_195 = arith.constant 2 : index
    %c0_196 = arith.constant 0 : index
    %c0_197 = arith.constant 0 : index
    %298 = vector.load %arg13[%c2_195, %c0_196, %c0_197] : memref<3x1x32xf32, #tpu.memory_space<vmem>>, vector<1x1x32xf32>
    %299 = vector.shape_cast %298 : vector<1x1x32xf32> to vector<1x32xf32>
    %300 = vector.broadcast %299 : vector<1x32xf32> to vector<24x32xf32>
    %301 = arith.addf %297, %300 : vector<24x32xf32>
    %302 = vector.extract_strided_slice %301 {offsets = [0, 0], sizes = [24, 16], strides = [1, 1]} : vector<24x32xf32> to vector<24x16xf32>
    %cst_198 = arith.constant dense<0.000000e+00> : vector<8x16xf32>
    %303 = tpu.matmul %9, %302, %cst_198 {dimension_numbers = #tpu.dot_dimension_numbers<[1], [0], [0], [1], [0, 0, 1, 1], [], []>} : vector<8x24xf32>, vector<24x16xf32>, vector<8x16xf32> -> vector<8x16xf32>
    %304 = vector.extract_strided_slice %301 {offsets = [0, 16], sizes = [24, 16], strides = [1, 1]} : vector<24x32xf32> to vector<24x16xf32>
    %305 = tpu.concatenate %304, %275 in 1 : vector<24x16xf32>, vector<24x1xf32> -> vector<24x17xf32>
    %cst_199 = arith.constant dense<0.000000e+00> : vector<8x17xf32>
    %306 = tpu.matmul %8, %305, %cst_199 {dimension_numbers = #tpu.dot_dimension_numbers<[1], [0], [0], [1], [0, 0, 1, 1], [], []>} : vector<8x24xf32>, vector<24x17xf32>, vector<8x17xf32> -> vector<8x17xf32>
    %307 = vector.extract_strided_slice %306 {offsets = [0, 0], sizes = [8, 16], strides = [1, 1]} : vector<8x17xf32> to vector<8x16xf32>
    %308 = vector.extract_strided_slice %306 {offsets = [0, 16], sizes = [8, 1], strides = [1, 1]} : vector<8x17xf32> to vector<8x1xf32>
    %309 = arith.mulf %11, %248 : vector<8x1xf32>
    %310 = arith.addf %19, %309 : vector<8x1xf32>
    %311 = arith.addf %310, %308 : vector<8x1xf32>
    %312 = arith.mulf %311, %311 : vector<8x1xf32>
    %313 = vector.shape_cast %312 : vector<8x1xf32> to vector<1x8x1xf32>
    %cst_200 = arith.constant dense<0.000000e+00> : vector<1xf32>
    %314 = vector.multi_reduction <add>, %313, %cst_200 [1, 2] : vector<1x8x1xf32> to vector<1xf32>
    %315 = vector.shape_cast %314 : vector<1xf32> to vector<1x1x1xf32>
    %316 = vector.extract %315[0, 0, 0] : f32 from vector<1x1x1xf32>
    %cst_201 = arith.constant 8.000000e+00 : f32
    %317 = arith.divf %316, %cst_201 : f32
    %c2_202 = arith.constant 2 : index
    %318 = memref.load %arg23[%c2_202] : memref<4xf32, #tpu.memory_space<smem>>
    memref.store %317, %arg23[%c2_202] : memref<4xf32, #tpu.memory_space<smem>>
    %319 = tpu.concatenate %232, %303, %307, %2 in 1 : vector<8x16xf32>, vector<8x16xf32>, vector<8x16xf32>, vector<8x3xf32> -> vector<8x51xf32>
    %c2_203 = arith.constant 2 : index
    %c0_204 = arith.constant 0 : index
    %c0_205 = arith.constant 0 : index
    %320 = vector.load %arg14[%c2_203, %c0_204, %c0_205] : memref<3x51x16xf32, #tpu.memory_space<vmem>>, vector<1x51x16xf32>
    %321 = vector.shape_cast %320 : vector<1x51x16xf32> to vector<51x16xf32>
    %cst_206 = arith.constant dense<0.000000e+00> : vector<8x16xf32>
    %322 = tpu.matmul %319, %321, %cst_206 {dimension_numbers = #tpu.dot_dimension_numbers<[1], [0], [0], [1], [0, 0, 1, 1], [], []>} : vector<8x51xf32>, vector<51x16xf32>, vector<8x16xf32> -> vector<8x16xf32>
    %c2_207 = arith.constant 2 : index
    %c0_208 = arith.constant 0 : index
    %c0_209 = arith.constant 0 : index
    %323 = vector.load %arg15[%c2_207, %c0_208, %c0_209] : memref<3x1x16xf32, #tpu.memory_space<vmem>>, vector<1x1x16xf32>
    %324 = vector.shape_cast %323 : vector<1x1x16xf32> to vector<1x16xf32>
    %325 = vector.broadcast %324 : vector<1x16xf32> to vector<8x16xf32>
    %326 = arith.addf %322, %325 : vector<8x16xf32>
    %cst_210 = arith.constant 0.000000e+00 : f32
    %327 = vector.broadcast %cst_210 : f32 to vector<8x16xf32>
    %328 = arith.maximumf %326, %327 : vector<8x16xf32>
    %c2_211 = arith.constant 2 : index
    %c0_212 = arith.constant 0 : index
    %c0_213 = arith.constant 0 : index
    %329 = vector.load %arg16[%c2_211, %c0_212, %c0_213] : memref<3x16x16xf32, #tpu.memory_space<vmem>>, vector<1x16x16xf32>
    %330 = vector.shape_cast %329 : vector<1x16x16xf32> to vector<16x16xf32>
    %cst_214 = arith.constant dense<0.000000e+00> : vector<8x16xf32>
    %331 = tpu.matmul %328, %330, %cst_214 {dimension_numbers = #tpu.dot_dimension_numbers<[1], [0], [0], [1], [0, 0, 1, 1], [], []>} : vector<8x16xf32>, vector<16x16xf32>, vector<8x16xf32> -> vector<8x16xf32>
    %c2_215 = arith.constant 2 : index
    %c0_216 = arith.constant 0 : index
    %c0_217 = arith.constant 0 : index
    %332 = vector.load %arg17[%c2_215, %c0_216, %c0_217] : memref<3x1x16xf32, #tpu.memory_space<vmem>>, vector<1x1x16xf32>
    %333 = vector.shape_cast %332 : vector<1x1x16xf32> to vector<1x16xf32>
    %334 = vector.broadcast %333 : vector<1x16xf32> to vector<8x16xf32>
    %335 = arith.addf %331, %334 : vector<8x16xf32>
    %cst_218 = arith.constant 1.000000e-01 : f32
    %336 = vector.broadcast %cst_218 : f32 to vector<8x16xf32>
    %337 = arith.mulf %336, %335 : vector<8x16xf32>
    %338 = arith.addf %232, %337 : vector<8x16xf32>
    %c2_219 = arith.constant 2 : index
    %c0_220 = arith.constant 0 : index
    %c0_221 = arith.constant 0 : index
    %339 = vector.load %arg18[%c2_219, %c0_220, %c0_221] : memref<3x16x16xf32, #tpu.memory_space<vmem>>, vector<1x16x16xf32>
    %340 = vector.shape_cast %339 : vector<1x16x16xf32> to vector<16x16xf32>
    %cst_222 = arith.constant dense<0.000000e+00> : vector<8x16xf32>
    %341 = tpu.matmul %338, %340, %cst_222 {dimension_numbers = #tpu.dot_dimension_numbers<[1], [0], [0], [1], [0, 0, 1, 1], [], []>} : vector<8x16xf32>, vector<16x16xf32>, vector<8x16xf32> -> vector<8x16xf32>
    %c2_223 = arith.constant 2 : index
    %c0_224 = arith.constant 0 : index
    %c0_225 = arith.constant 0 : index
    %342 = vector.load %arg19[%c2_223, %c0_224, %c0_225] : memref<3x1x16xf32, #tpu.memory_space<vmem>>, vector<1x1x16xf32>
    %343 = vector.shape_cast %342 : vector<1x1x16xf32> to vector<1x16xf32>
    %344 = vector.broadcast %343 : vector<1x16xf32> to vector<8x16xf32>
    %345 = arith.addf %341, %344 : vector<8x16xf32>
    %cst_226 = arith.constant 0.000000e+00 : f32
    %346 = vector.broadcast %cst_226 : f32 to vector<8x16xf32>
    %347 = arith.maximumf %345, %346 : vector<8x16xf32>
    %c2_227 = arith.constant 2 : index
    %c0_228 = arith.constant 0 : index
    %c0_229 = arith.constant 0 : index
    %348 = vector.load %arg20[%c2_227, %c0_228, %c0_229] : memref<3x16x1xf32, #tpu.memory_space<vmem>>, vector<1x16x1xf32>
    %349 = vector.shape_cast %348 : vector<1x16x1xf32> to vector<16x1xf32>
    %cst_230 = arith.constant dense<0.000000e+00> : vector<8x1xf32>
    %350 = tpu.matmul %347, %349, %cst_230 {dimension_numbers = #tpu.dot_dimension_numbers<[1], [0], [0], [1], [0, 0, 1, 1], [], []>} : vector<8x16xf32>, vector<16x1xf32>, vector<8x1xf32> -> vector<8x1xf32>
    %c2_231 = arith.constant 2 : index
    %c0_232 = arith.constant 0 : index
    %c0_233 = arith.constant 0 : index
    %351 = vector.load %arg21[%c2_231, %c0_232, %c0_233] : memref<3x1x1xf32, #tpu.memory_space<vmem>>, vector<1x1x1xf32>
    %352 = vector.shape_cast %351 : vector<1x1x1xf32> to vector<1x1xf32>
    %353 = vector.broadcast %352 : vector<1x1xf32> to vector<8x1xf32>
    %354 = arith.addf %350, %353 : vector<8x1xf32>
    %c3 = arith.constant 3 : index
    %c0_234 = arith.constant 0 : index
    %c0_235 = arith.constant 0 : index
    %355 = vector.load %arg22[%c3, %c0_234, %c0_235] : memref<4x8x1xf32, #tpu.memory_space<vmem>>, vector<1x8x1xf32>
    %356 = vector.shape_cast %355 : vector<1x8x1xf32> to vector<8x1xf32>
    %357 = vector.shape_cast %354 : vector<8x1xf32> to vector<1x8x1xf32>
    tpu.vector_store %arg22[%c3, %c0_234, %c0_235], %357 {strides = array<i32>} : memref<4x8x1xf32, #tpu.memory_space<vmem>>, vector<1x8x1xf32>,
    %358 = arith.subf %354, %0 : vector<8x1xf32>
    %359 = arith.mulf %358, %358 : vector<8x1xf32>
    %360 = vector.shape_cast %359 : vector<8x1xf32> to vector<1x8x1xf32>
    %cst_236 = arith.constant dense<0.000000e+00> : vector<1xf32>
    %361 = vector.multi_reduction <add>, %360, %cst_236 [1, 2] : vector<1x8x1xf32> to vector<1xf32>
    %362 = vector.shape_cast %361 : vector<1xf32> to vector<1x1x1xf32>
    %363 = vector.extract %362[0, 0, 0] : f32 from vector<1x1x1xf32>
    %cst_237 = arith.constant 8.000000e+00 : f32
    %364 = arith.divf %363, %cst_237 : f32
    %c3_238 = arith.constant 3 : index
    %365 = memref.load %arg24[%c3_238] : memref<4xf32, #tpu.memory_space<smem>>
    memref.store %364, %arg24[%c3_238] : memref<4xf32, #tpu.memory_space<smem>>
    %366 = arith.mulf %358, %358 : vector<8x1xf32>
    %367 = arith.mulf %366, %7 : vector<8x1xf32>
    %368 = vector.shape_cast %367 : vector<8x1xf32> to vector<1x8x1xf32>
    %cst_239 = arith.constant dense<0.000000e+00> : vector<1xf32>
    %369 = vector.multi_reduction <add>, %368, %cst_239 [1, 2] : vector<1x8x1xf32> to vector<1xf32>
    %370 = vector.shape_cast %369 : vector<1xf32> to vector<1x1x1xf32>
    %371 = vector.extract %370[0, 0, 0] : f32 from vector<1x1x1xf32>
    %c3_240 = arith.constant 3 : index
    %372 = memref.load %arg25[%c3_240] : memref<4xf32, #tpu.memory_space<smem>>
    memref.store %371, %arg25[%c3_240] : memref<4xf32, #tpu.memory_space<smem>>
    %cst_241 = arith.constant dense<0.000000e+00> : vector<24x1xf32>
    %373 = tpu.matmul %5, %354, %cst_241 {dimension_numbers = #tpu.dot_dimension_numbers<[1], [0], [0], [1], [0, 0, 1, 1], [], []>} : vector<24x8xf32>, vector<8x1xf32>, vector<24x1xf32> -> vector<24x1xf32>
    %cst_242 = arith.constant dense<0.000000e+00> : vector<24x1xf32>
    %374 = tpu.matmul %6, %354, %cst_242 {dimension_numbers = #tpu.dot_dimension_numbers<[1], [0], [0], [1], [0, 0, 1, 1], [], []>} : vector<24x8xf32>, vector<8x1xf32>, vector<24x1xf32> -> vector<24x1xf32>
    %375 = arith.subf %374, %373 : vector<24x1xf32>
    %376 = arith.mulf %3, %375 : vector<24x1xf32>
    %cst_243 = arith.constant dense<0.000000e+00> : vector<8x1xf32>
    %377 = tpu.matmul %8, %376, %cst_243 {dimension_numbers = #tpu.dot_dimension_numbers<[1], [0], [0], [1], [0, 0, 1, 1], [], []>} : vector<8x24xf32>, vector<24x1xf32>, vector<8x1xf32> -> vector<8x1xf32>
    %378 = arith.mulf %11, %354 : vector<8x1xf32>
    %379 = arith.addf %19, %378 : vector<8x1xf32>
    %380 = arith.addf %379, %377 : vector<8x1xf32>
    %381 = arith.mulf %380, %380 : vector<8x1xf32>
    %382 = vector.shape_cast %381 : vector<8x1xf32> to vector<1x8x1xf32>
    %cst_244 = arith.constant dense<0.000000e+00> : vector<1xf32>
    %383 = vector.multi_reduction <add>, %382, %cst_244 [1, 2] : vector<1x8x1xf32> to vector<1xf32>
    %384 = vector.shape_cast %383 : vector<1xf32> to vector<1x1x1xf32>
    %385 = vector.extract %384[0, 0, 0] : f32 from vector<1x1x1xf32>
    %cst_245 = arith.constant 8.000000e+00 : f32
    %386 = arith.divf %385, %cst_245 : f32
    %c3_246 = arith.constant 3 : index
    %387 = memref.load %arg23[%c3_246] : memref<4xf32, #tpu.memory_space<smem>>
    memref.store %386, %arg23[%c3_246] : memref<4xf32, #tpu.memory_space<smem>>
    return
  }
}

</mosaic_0001>

<bundles_post_ra>
// kernel: tpu_custom_call.1
= control target key start
LH: loop header
LB: loop body
LE: loop exit
PB: predicated region body
PF: predicated region fallthrough
CT: control target
= control target key end

     0   :  { %s5851_s0 = inlined_call_operand.vmem [shape: f32[8,1], index: 0, kind: input, shape index: {}]   ;;  %s5852_s1 = inlined_call_operand.vmem [shape: f32[8,3], index: 1, kind: input, shape index: {}]   ;;  %s5853_s2 = inlined_call_operand.vmem [shape: f32[8,3], index: 2, kind: input, shape index: {}]   ;;  %s5854_s3 = inlined_call_operand.vmem [shape: f32[24,1], index: 3, kind: input, shape index: {}]   ;;  %s5855_s4 = inlined_call_operand.vmem [shape: f32[24,1], index: 4, kind: input, shape index: {}]   ;;  %s5856_s5 = inlined_call_operand.vmem [shape: f32[24,8], index: 5, kind: input, shape index: {}]   ;;  %s5857_s6 = inlined_call_operand.vmem [shape: f32[24,8], index: 6, kind: input, shape index: {}]   ;;  %s5858_s7 = inlined_call_operand.vmem [shape: f32[8,1], index: 7, kind: input, shape index: {}]   ;;  %s5859_s8 = inlined_call_operand.vmem [shape: f32[3,16,32], index: 8, kind: input, shape index: {}]   ;;  %s5860_s9 = inlined_call_operand.vmem [shape: f32[3,16,32], index: 9, kind: input, shape index: {}]   ;;  %s5861_s10 = inlined_call_operand.vmem [shape: f32[3,1,32], index: 10, kind: input, shape index: {}]   ;;  %s5862_s11 = inlined_call_operand.vmem [shape: f32[3,1,32], index: 11, kind: input, shape index: {}]   ;;  %s5863_s12 = inlined_call_operand.vmem [shape: f32[3,32,32], index: 12, kind: input, shape index: {}]   ;;  %s5864_s13 = inlined_call_operand.vmem [shape: f32[3,1,32], index: 13, kind: input, shape index: {}]   ;;  %s5865_s14 = inlined_call_operand.vmem [shape: f32[3,51,16], index: 14, kind: input, shape index: {}]   ;;  %s5866_s15 = inlined_call_operand.vmem [shape: f32[3,1,16], index: 15, kind: input, shape index: {}]   ;;  %s5867_s16 = inlined_call_operand.vmem [shape: f32[3,16,16], index: 16, kind: input, shape index: {}]   ;;  %s5868_s17 = inlined_call_operand.vmem [shape: f32[3,1,16], index: 17, kind: input, shape index: {}]   ;;  %s5869_s18 = inlined_call_operand.vmem [shape: f32[3,16,16], index: 18, kind: input, shape index: {}]   ;;  %s5870_s19 = inlined_call_operand.vmem [shape: f32[3,1,16], index: 19, kind: input, shape index: {}]   ;;  %s5871_s20 = inlined_call_operand.vmem [shape: f32[3,16,1], index: 20, kind: input, shape index: {}]   ;;  %s5872_s21 = inlined_call_operand.vmem [shape: f32[3,1,1], index: 21, kind: input, shape index: {}]   ;;  %s5873_s22 = inlined_call_operand.vmem [shape: f32[4,8,1], index: 22, kind: output, shape index: {0}]   ;;  %s5874_s23 = inlined_call_operand.hbm [shape: f32[4], index: 23, kind: output, shape index: {1}]   ;;  %s5875_s24 = inlined_call_operand.hbm [shape: f32[4], index: 24, kind: output, shape index: {2}]   ;;  %s5876_s25 = inlined_call_operand.hbm [shape: f32[4], index: 25, kind: output, shape index: {3}]  }
   0x1   :  { %5885 = sst [smem:[#allocation9_spill]] %s5851_s0 }
   0x2   :  { %5886 = sst [smem:[#allocation10_spill]] %s5852_s1 }
   0x3   :  { %5887 = sst [smem:[#allocation11_spill]] %s5853_s2 }
   0x4   :  { %5888 = sst [smem:[#allocation12_spill]] %s5854_s3 }
   0x5   :  { %5889 = sst [smem:[#allocation13_spill]] %s5855_s4 }
   0x6   :  { %5890 = sst [smem:[#allocation14_spill]] %s5856_s5 }
   0x7   :  { %5891 = sst [smem:[#allocation15_spill]] %s5857_s6 }
   0x8   :  { %5892 = sst [smem:[#allocation16_spill]] %s5858_s7 }
   0x9   :  { %5893 = sst [smem:[#allocation17_spill]] %s5859_s8 }
   0xa   :  { %5894 = sst [smem:[#allocation18_spill]] %s5860_s9 }
   0xb   :  { %31 = vsyncpa [#allocation3], 0  ;;  %v4920_v0 = vld [vmem:[%s5869_s18 + $0x8] sm:$0xff]  ;;  %v4774_v1 = vmov 0.0   ;;  %v4926_v2 = vld [vmem:[%s5869_s18] sm:$0xff]  ;;  %vm4775_vm0 = vmmov 0  }
   0xc   :  { %4290 = vmatprep.subr.mxu0 %v4774_v1  ;;  %4294 = vmatprep.mubr.msk.f32.mxu0 %vm4775_vm0, %v4774_v1 }
   0xd   :  { %32 = vsyncpa [#allocation5], 0  ;;  %4291 = vmatpush3.msra.mxu0 %v4920_v0  ;;  %4297 = vmatprep.subr.mxu1 %v4774_v1  ;;  %v4943_v3 = vld [vmem:[%s5871_s20 + $0x8] sm:$0xff]  ;;  %v4950_v4 = vld [vmem:[%s5871_s20] sm:$0xff]  ;;  %vm179_vm1 = vcmask 130048   ;;  %s5895_s0 = sld [smem:[#allocation13_spill]] }
   0xe   :  { %4292 = vmatprep.subr.mxu0 %v4774_v1  ;;  %4301 = vmatprep.mubr.msk.f32.mxu1 %vm4775_vm0, %v4774_v1  ;;  %v4957_v5 = vld [vmem:[%s5870_s19] ss:$0 sm:$0xff]  ;;  %vm336_vm2 = vcmask 7168   ;;  %v4776_v13 = vmov 0   ;;  %s4777_s7 = smov 16   ;;  %vm3965_vm3 = vmneg %vm179_vm1  ;;  %s5896_s27 = sld [smem:[#allocation14_spill]] }
   0xf   :  { %4293 = vmatpush3.msra.mxu0 %v4926_v2  ;;  %4298 = vmatpush3.msra.mxu1 %v4943_v3  ;;  %v4966_v10 = vld [vmem:[%s5872_s21] ss:$0 sm:$0xff]  ;;  %vm373_vm4 = vcmask 64512   ;;  %s5897_s9 = sld [smem:[#allocation15_spill]]  ;;  %s5883_s1 = smov 112   ;;  %v796_v44 = vld [vmem:[%s5863_s12 + $0x18] sm:$0xff] }
  0x10   :  { %4295 = vmatmul.mubr.f32.vlgmr.msra.gmra.mxu0 %v4774_v1  ;;  %4304 = vmatprep.subr.mxu0 %v4774_v1  ;;  %s5898_s29 = sld [smem:[#allocation18_spill]]  ;;  %v795_v45 = vld [vmem:[%s5863_s12 + $0x10] sm:$0xff]  ;;  %v794_v46 = vld [vmem:[%s5863_s12 + $0x8] sm:$0xff]  ;;  %v793_v47 = vld [vmem:[%s5863_s12] sm:$0xff]  ;;  %vm804_vm5 = vcmask 261120   ;;  %vm894_vm6 = vcmask 195584  }
  0x11   :  { %4306 = vmatprep.mubr.msk.f32.mxu0 %vm4775_vm0, %v4774_v1  ;;  %4299 = vmatprep.subr.mxu1 %v4774_v1  ;;  %s5899_s30 = sld [smem:[#allocation17_spill]]  ;;  %v3981_v60 = vld [vmem:[%s5861_s10] ss:$0 sm:$0xff]  ;;  %vm1131_vm7 = vcmask 1042432   ;;  %s4779_s2 = smov 48   ;;  %vm1111_vm8 = vcmask 392192  }
  0x12   :  { %4300 = vmatpush3.msra.mxu1 %v4950_v4  ;;  %4736 = vset.pattern.permute.xlu1 %v4776_v13  ;;  %s5900_s4 = sld [smem:[#allocation12_spill]]  ;;  %s4780_s6 = smov 32   ;;  %vm1127_vm9 = vcmask 416768  }
  0x13   :  { %4315 = vmatprep.subr.mxu1 %v4774_v1  ;;  %v84_v11 = vld [vmem:[%s5895_s0 + $0x8] sm:$0xff]  ;;  %4735 = vset.pattern.permute.xlu0 %v4776_v13  ;;  %v85_v16 = vld [vmem:[%s5895_s0 + $0x10] sm:$0xff]  ;;  %v83_v17 = vld [vmem:[%s5895_s0] sm:$0xff]  ;;  %s5901_s0 = sld [smem:[#allocation11_spill]]  ;;  %s4783_s28 = smov 127  }
  0x14   :  { %760 = vperm.xlu1 %4736, %v84_v11   ;;  %v4991_v18 = vld [vmem:[%s5896_s27] sm:$0xff]  ;;  %v5015_v23 = vld [vmem:[%s5896_s27 + $0x8] sm:$0xff]  ;;  %v5035_v25 = vld [vmem:[%s5896_s27 + $0x10] sm:$0xff]  ;;  %s5903_s26 = sld [smem:[#allocation10_spill]] }
  0x15   :  { %v4996_v19 = vld [vmem:[%s5897_s9] sm:$0xff]  ;;  %v5020_v24 = vld [vmem:[%s5897_s9 + $0x8] sm:$0xff]  ;;  %v5040_v26 = vld [vmem:[%s5897_s9 + $0x10] sm:$0xff]  ;;  %s5904_s5 = sld [smem:[#allocation9_spill]] }
  0x16   :  { %v573_v21 = vld [vmem:[%s5898_s29 + $0x8] sm:$0xff]  ;;  %v572_v27 = vld [vmem:[%s5898_s29] sm:$0xff] }
  0x17   :  { %v571_v22 = vld [vmem:[%s5899_s30 + $0x8] sm:$0xff]  ;;  %v570_v28 = vld [vmem:[%s5899_s30] sm:$0xff] }
  0x18   :  { %765 = vperm.xlu1 %4736, %v85_v16   ;;  %v5106_v52 = vld [vmem:[%s5900_s4] sm:$0xff]  ;;  %v5112_v56 = vld [vmem:[%s5900_s4 + $0x8] sm:$0xff]  ;;  %v5119_v58 = vld [vmem:[%s5900_s4 + $0x10] sm:$0xff] }
  0x8f   :  { %v5097_v48 = vpop.permute.xlu1 %760 }
  0x90   :  { %v775_v11 = vmul.f32 %v3981_v60, %v5097_v48 }
  0x93   :  { %v5099_v49 = vpop.permute.xlu1 %765 }
  0xd0   :  { %v249_v6 = vpop.f32.mrf.mxu0 }
  0xd1   :  { %v250_v7 = vadd.f32 %v4957_v5, %v249_v6 }
  0xd2   :  { %v4296_v8 = vpop.f32.mrf.mxu0 }
  0xd3   :  { %v253_v9 = vmax.f32 %v250_v7, 0.0  ;;  %v3982_v7 = vld [vmem:[%s5862_s11] ss:$0 sm:$0xff] }
  0xd5   :  { %4302 = vmatmul.mubr.msk.f32.vlgmr.msra.gmra.mxu1 %vm179_vm1, %v253_v9 }
  0xd6   :  { %4317 = vmatprep.mubr.msk.f32.mxu1 %vm4775_vm0, %v4774_v1 }
 0x195   :  { %v332_v12 = vpop.f32.mrf.mxu1 }
 0x196   :  { %v4972_v14 = vadd.f32 %v4966_v10, %v332_v12 }
 0x197   :  { %v4303_v15 = vpop.f32.mrf.mxu1 }
 0x198   :  { %337 = vst.msk [vmem:[%s5873_s22] sm:$0xff] %vm336_vm2, %v4972_v14  ;;  %369 = vrot.lane.b32.xlu0 %v4972_v14, %s4777_s7 }
 0x19c   :  { %755 = vperm.xlu0 %4735, %v83_v17  }
 0x20a   :  { %v370_v20 = vpop.permute.xlu0 %369 }
 0x20b   :  { %4305 = vmatpush3.msk.msra.mxu0 %vm3965_vm3, %v370_v20  ;;  %4316 = vmatpush3.msk.msra.mxu1 %vm3965_vm3, %v370_v20 }
 0x20c   :  { %4307 = vmatmul.mubr.msk.f32.vlgmr.msra.gmra.mxu0 %vm373_vm4, %v4991_v18  ;;  %4318 = vmatmul.mubr.msk.f32.vlgmr.msra.gmra.mxu1 %vm373_vm4, %v4996_v19 }
 0x20d   :  { %4309 = vmatprep.mubr.msk.f32.mxu0 %vm4775_vm0, %v4774_v1  ;;  %4320 = vmatprep.mubr.msk.f32.mxu1 %vm4775_vm0, %v4774_v1 }
 0x20e   :  { %4326 = vmatprep.subr.mxu0 %v4774_v1  ;;  %4339 = vmatprep.subr.mxu1 %v4774_v1 }
 0x20f   :  { %4327 = vmatpush3.msra.mxu0 %v573_v21  ;;  %4340 = vmatpush3.msra.mxu1 %v571_v22 }
 0x210   :  { %4310 = vmatmul.mubr.msk.f32.gmra.mxu0 %vm373_vm4, %v5015_v23  ;;  %4321 = vmatmul.mubr.msk.f32.gmra.mxu1 %vm373_vm4, %v5020_v24 }
 0x211   :  { %4312 = vmatprep.mubr.msk.f32.mxu0 %vm4775_vm0, %v4774_v1  ;;  %4323 = vmatprep.mubr.msk.f32.mxu1 %vm4775_vm0, %v4774_v1 }
 0x212   :  { %4328 = vmatprep.subr.mxu0 %v4774_v1  ;;  %4341 = vmatprep.subr.mxu1 %v4774_v1 }
 0x213   :  { %4329 = vmatpush3.msra.mxu0 %v572_v27  ;;  %4342 = vmatpush3.msra.mxu1 %v570_v28 }
 0x214   :  { %4313 = vmatmul.mubr.msk.f32.gmra.mxu0 %vm373_vm4, %v5035_v25  ;;  %4324 = vmatmul.mubr.msk.f32.gmra.mxu1 %vm373_vm4, %v5040_v26 }
 0x215   :  { %4330 = vmatprep.mubr.msk.f32.mxu0 %vm4775_vm0, %v4774_v1  ;;  %4343 = vmatprep.mubr.msk.f32.mxu1 %vm4775_vm0, %v4774_v1 }
 0x216   :  { %4352 = vmatprep.subr.mxu0 %v4774_v1  ;;  %4369 = vmatprep.subr.mxu1 %v4774_v1 }
 0x217   :  { %v5101_v50 = vpop.permute.xlu0 %755 }
 0x218   :  { %v774_v61 = vmul.f32 %v3981_v60, %v5101_v50 }
 0x2cc   :  { %v449_v29 = vpop.f32.mrf.mxu0  ;;  %v538_v30 = vpop.f32.mrf.mxu1 }
 0x2cd   :  { %4331 = vmatmul.mubr.msk.f32.vlgmr.msra.gmra.mxu0 %vm179_vm1, %v449_v29  ;;  %4344 = vmatmul.mubr.msk.f32.vlgmr.msra.gmra.mxu1 %vm179_vm1, %v538_v30  ;;  %v552_v43 = vsub.f32 %v538_v30, %v449_v29  ;;  %v776_v30 = vmul.f32 %v3981_v60, %v5099_v49 }
 0x2ce   :  { %v4308_v31 = vpop.f32.mrf.mxu0  ;;  %v4319_v32 = vpop.f32.mrf.mxu1  ;;  %4333 = vmatprep.mubr.msk.f32.mxu0 %vm4775_vm0, %v4774_v1  ;;  %4346 = vmatprep.mubr.msk.f32.mxu1 %vm4775_vm0, %v4774_v1 }
 0x2cf   :  { %4353 = vmatpush3.msra.mxu0 %v796_v44 }
 0x2d0   :  { %v454_v33 = vpop.f32.mrf.mxu0  ;;  %v543_v34 = vpop.f32.mrf.mxu1  ;;  %4354 = vmatprep.subr.mxu0 %v4774_v1 }
 0x2d1   :  { %v553_v35 = vsub.f32 %v543_v34, %v454_v33  ;;  %4334 = vmatmul.mubr.msk.f32.gmra.mxu0 %vm179_vm1, %v454_v33  ;;  %4347 = vmatmul.mubr.msk.f32.gmra.mxu1 %vm179_vm1, %v543_v34 }
 0x2d2   :  { %v4311_v36 = vpop.f32.mrf.mxu0  ;;  %v4322_v37 = vpop.f32.mrf.mxu1  ;;  %4336 = vmatprep.mubr.msk.f32.mxu0 %vm4775_vm0, %v4774_v1  ;;  %4349 = vmatprep.mubr.msk.f32.mxu1 %vm4775_vm0, %v4774_v1 }
 0x2d3   :  { %560 = vrot.lane.b32.xlu0 %v553_v35, %s5883_s1  ;;  %4355 = vmatpush3.msra.mxu0 %v795_v45 }
 0x2d4   :  { %v459_v38 = vpop.f32.mrf.mxu0  ;;  %v548_v39 = vpop.f32.mrf.mxu1  ;;  %4356 = vmatprep.subr.mxu0 %v4774_v1 }
 0x2d5   :  { %v554_v40 = vsub.f32 %v548_v39, %v459_v38  ;;  %4337 = vmatmul.mubr.msk.f32.gmra.mxu0 %vm179_vm1, %v459_v38  ;;  %4350 = vmatmul.mubr.msk.f32.gmra.mxu1 %vm179_vm1, %v548_v39  ;;  %v3983_v39 = vld [vmem:[%s5864_s13] ss:$0 sm:$0xff] }
 0x2d6   :  { %v4314_v41 = vpop.f32.mrf.mxu0  ;;  %v4325_v42 = vpop.f32.mrf.mxu1  ;;  %4360 = vmatprep.mubr.msk.f32.mxu0 %vm4775_vm0, %v4774_v1  ;;  %4375 = vmatprep.mubr.msk.f32.mxu1 %vm4775_vm0, %v4774_v1 }
 0x2d7   :  { %562 = vrot.lane.b32.xlu1 %v554_v40, %s5883_s1  ;;  %4357 = vmatpush3.msra.mxu0 %v794_v46 }
 0x2d8   :  { %4358 = vmatprep.subr.mxu0 %v4774_v1 }
 0x2d9   :  { %4359 = vmatpush3.msra.mxu0 %v793_v47 }
 0x2da   :  { %4387 = vmatprep.subr.mxu0 %v4774_v1 }
 0x2db   :  { %558 = vrot.lane.b32.xlu1 %v552_v43, %s5883_s1 }
 0x345   :  { %v561_v55 = vpop.permute.xlu0 %560 }
 0x346   :  { %v568_v57 = vmul.f32 %v561_v55, %v5112_v56 }
 0x349   :  { %v563_v51 = vpop.permute.xlu1 %562 }
 0x34a   :  { %v569_v59 = vmul.f32 %v563_v51, %v5119_v58 }
 0x34d   :  { %v559_v53 = vpop.permute.xlu1 %558 }
 0x34e   :  { %v567_v54 = vmul.f32 %v559_v53, %v5106_v52 }
 0x350   :  { %983 = vrot.lane.b32.xlu1 %v567_v54, %s4777_s7 }
 0x354   :  { %985 = vrot.lane.b32.xlu1 %v568_v57, %s4777_s7 }
 0x358   :  { %987 = vrot.lane.b32.xlu1 %v569_v59, %s4777_s7 }
 0x381   :  { %93 = vxpose.xlu1.b32.start [1/3] (short) (narrow) %v4991_v18, 8 }
 0x385   :  { %94 = vxpose.xlu1.b32.cont [2/3] (short) (narrow) %v5015_v23, 8 }
 0x389   :  { %95 = vxpose.xlu1.b32.end [3/3] (short) (narrow) %v5035_v25, 8 }
 0x38d   :  { %v649_v62 = vpop.f32.mrf.mxu0  ;;  %v738_v63 = vpop.f32.mrf.mxu1 }
 0x38e   :  { %v739_v6 = vadd.f32 %v738_v63, %v649_v62 }
 0x38f   :  { %v4332_v8 = vpop.f32.mrf.mxu0  ;;  %v4345_v9 = vpop.f32.mrf.mxu1 }
 0x390   :  { %v777_v12 = vadd.f32 %v774_v61, %v739_v6  ;;  %v1119_v8 = vld [vmem:[%s5865_s14 + $0x30] sm:$0x7]  ;;  %v1118_v9 = vld [vmem:[%s5865_s14 + $0x28] sm:$0xff] }
 0x391   :  { %v654_v13 = vpop.f32.mrf.mxu0  ;;  %v743_v15 = vpop.f32.mrf.mxu1 }
 0x392   :  { %v787_v16 = vadd.f32 %v3982_v7, %v777_v12  ;;  %v744_v17 = vadd.f32 %v743_v15, %v654_v13  ;;  %v1116_v12 = vld [vmem:[%s5865_s14 + $0x18] sm:$0xff]  ;;  %v1115_v13 = vld [vmem:[%s5865_s14 + $0x10] sm:$0xff]  ;;  %v1114_v15 = vld [vmem:[%s5865_s14 + $0x8] sm:$0xff] }
 0x393   :  { %v4335_v20 = vpop.f32.mrf.mxu0  ;;  %v4348_v21 = vpop.f32.mrf.mxu1 }
 0x394   :  { %v790_v22 = vmax.f32 %v787_v16, 0.0  ;;  %v778_v27 = vadd.f32 %v775_v11, %v744_v17  ;;  %v1117_v11 = vld [vmem:[%s5865_s14 + $0x20] sm:$0xff] }
 0x395   :  { %v659_v28 = vpop.f32.mrf.mxu0  ;;  %v748_v29 = vpop.f32.mrf.mxu1  ;;  %v1113_v16 = vld [vmem:[%s5865_s14] sm:$0xff] }
 0x396   :  { %v788_v31 = vadd.f32 %v3982_v7, %v778_v27  ;;  %v749_v32 = vadd.f32 %v748_v29, %v659_v28  ;;  %4361 = vmatmul.mubr.msk.f32.vlgmr.msra.gmra.mxu0 %vm804_vm5, %v790_v22  ;;  %v79_v21 = vld [vmem:[%s5901_s0] sm:$0xff] }
 0x397   :  { %v4338_v33 = vpop.f32.mrf.mxu0  ;;  %v4351_v34 = vpop.f32.mrf.mxu1  ;;  %4363 = vmatprep.mubr.msk.f32.mxu0 %vm4775_vm0, %v4774_v1  ;;  %4388 = vmatpush3.msk.msra.mxu0 %vm1131_vm7, %v1119_v8 }
 0x398   :  { %v791_v35 = vmax.f32 %v788_v31, 0.0  ;;  %v779_v36 = vadd.f32 %v776_v30, %v749_v32  ;;  %4389 = vmatprep.subr.mxu0 %v4774_v1  ;;  %v1207_v34 = vld [vmem:[%s5867_s16 + $0x8] sm:$0xff] }
 0x399   :  { %4390 = vmatpush3.msra.mxu0 %v1118_v9 }
 0x39a   :  { %v789_v37 = vadd.f32 %v3982_v7, %v779_v36  ;;  %4364 = vmatmul.mubr.msk.f32.gmra.mxu0 %vm804_vm5, %v791_v35  ;;  %4391 = vmatprep.subr.mxu0 %v4774_v1 }
 0x39b   :  { %4366 = vmatprep.mubr.msk.f32.mxu0 %vm4775_vm0, %v4774_v1  ;;  %4392 = vmatpush3.msra.mxu0 %v1117_v11 }
 0x39c   :  { %v792_v38 = vmax.f32 %v789_v37, 0.0  ;;  %4393 = vmatprep.subr.mxu0 %v4774_v1 }
 0x39d   :  { %4394 = vmatpush3.msra.mxu0 %v1116_v12 }
 0x39e   :  { %4367 = vmatmul.mubr.msk.f32.gmra.mxu0 %vm804_vm5, %v792_v38  ;;  %4395 = vmatprep.subr.mxu0 %v4774_v1 }
 0x39f   :  { %4401 = vmatprep.mubr.msk.f32.mxu0 %vm4775_vm0, %v4774_v1  ;;  %4396 = vmatpush3.msra.mxu0 %v1115_v13 }
 0x3a0   :  { %4397 = vmatprep.subr.mxu0 %v4774_v1 }
 0x3a1   :  { %4398 = vmatpush3.msra.mxu0 %v1114_v15 }
 0x3a2   :  { %4399 = vmatprep.subr.mxu0 %v4774_v1 }
 0x3a3   :  { %4400 = vmatpush3.msra.mxu0 %v1113_v16 }
 0x3a4   :  { %4418 = vmatprep.subr.mxu0 %v4774_v1 }
 0x3c2   :  { %v984_v54 = vpop.permute.xlu1 %983 }
 0x3c6   :  { %v986_v57 = vpop.permute.xlu1 %985 }
 0x3ca   :  { %v988_v60 = vpop.permute.xlu1 %987 }
 0x3fd   :  { %v5166_v6 = vpop.trf.xlu1 }
 0x456   :  { %v880_v40 = vpop.f32.mrf.mxu0 }
 0x457   :  { %v881_v41 = vadd.f32 %v3983_v39, %v880_v40 }
 0x458   :  { %v4362_v42 = vpop.f32.mrf.mxu0 }
 0x459   :  { %971 = vrot.lane.b32.xlu0 %v881_v41, %s5883_s1 }
 0x45a   :  { %v885_v43 = vpop.f32.mrf.mxu0 }
 0x45b   :  { %v886_v44 = vadd.f32 %v3983_v39, %v885_v43 }
 0x45c   :  { %v4365_v45 = vpop.f32.mrf.mxu0 }
 0x45d   :  { %973 = vrot.lane.b32.xlu0 %v886_v44, %s5883_s1 }
 0x45e   :  { %v890_v46 = vpop.f32.mrf.mxu0 }
 0x45f   :  { %v891_v47 = vadd.f32 %v3983_v39, %v890_v46  ;;  %v3992_v39 = vld [vmem:[%s5868_s17] ss:$0 sm:$0xff] }
 0x460   :  { %v4368_v51 = vpop.f32.mrf.mxu0 }
 0x461   :  { %975 = vrot.lane.b32.xlu0 %v891_v47, %s5883_s1  ;;  %4370 = vmatpush3.msra.mxu1 %v891_v47 }
 0x462   :  { %4371 = vmatprep.subr.mxu1 %v4774_v1 }
 0x463   :  { %4372 = vmatpush3.msra.mxu1 %v886_v44 }
 0x464   :  { %4373 = vmatprep.subr.mxu1 %v4774_v1 }
 0x465   :  { %4374 = vmatpush3.msra.mxu1 %v881_v41 }
 0x466   :  { %4378 = vmatprep.subr.mxu1 %v4774_v1 }
 0x47f   :  { %125 = vxpose.xlu0.b32.start [1/3] (short) (narrow) %v4996_v19, 8 }
 0x483   :  { %126 = vxpose.xlu0.b32.cont [2/3] (short) (narrow) %v5020_v24, 8 }
 0x487   :  { %127 = vxpose.xlu0.b32.end [3/3] (short) (narrow) %v5040_v26, 8 }
 0x4cb   :  { %v972_v53 = vpop.permute.xlu0 %971 }
 0x4cc   :  { %v992_v7 = vsel %vm179_vm1, %v972_v53, %v984_v54  ;;  %v4006_v54 = vld [vmem:[%s5899_s30 + $0x18] sm:$0xff] }
 0x4cf   :  { %v974_v55 = vpop.permute.xlu0 %973 }
 0x4d0   :  { %v993_v63 = vsel %vm179_vm1, %v974_v55, %v986_v57  ;;  %v4007_v55 = vld [vmem:[%s5898_s29 + $0x10] sm:$0xff] }
 0x4d1   :  { %v4005_v57 = vld [vmem:[%s5899_s30 + $0x10] sm:$0xff] }
 0x4d3   :  { %v976_v59 = vpop.permute.xlu0 %975 }
 0x4d4   :  { %v994_v62 = vsel %vm179_vm1, %v976_v59, %v988_v60 }
 0x4fb   :  { %v5157_v61 = vpop.trf.xlu0 }
 0x4fc   :  { %4376 = vmatmul.mubr.msk.f32.vlgmr.msra.gmra.mxu1 %vm894_vm6, %v5157_v61 }
 0x4fd   :  { %4379 = vmatpush3.msra.mxu1 %v994_v62  ;;  %4384 = vmatprep.mubr.msk.f32.mxu1 %vm4775_vm0, %v4774_v1 }
 0x4fe   :  { %4380 = vmatprep.subr.mxu1 %v4774_v1 }
 0x4ff   :  { %4381 = vmatpush3.msra.mxu1 %v993_v63 }
 0x500   :  { %4382 = vmatprep.subr.mxu1 %v4774_v1 }
 0x501   :  { %4383 = vmatpush3.msra.mxu1 %v992_v7 }
 0x502   :  { %4385 = vmatmul.mubr.msk.f32.vlgmr.msra.gmra.mxu1 %vm894_vm6, %v5166_v6  ;;  %4404 = vmatprep.subr.mxu1 %v4774_v1 }
 0x503   :  { %4408 = vmatprep.mubr.msk.f32.mxu1 %vm4775_vm0, %v4774_v1  ;;  %4405 = vmatpush3.msra.mxu1 %v1207_v34 }
 0x504   :  { %4406 = vmatprep.subr.mxu1 %v4774_v1 }
 0x5bc   :  { %v964_v17 = vpop.f32.mrf.mxu1 }
 0x5bd   :  { %1099 = vrot.lane.b32.xlu0 %v964_v17, %s4777_s7 }
 0x5be   :  { %v4377_v20 = vpop.f32.mrf.mxu1 }
 0x5c1   :  { %1106 = vrot.lane.b32.xlu0 %v79_v21, %s4779_s2  ;;  %s4781_s2 = smov 1  }
 0x5c2   :  { %v5208_v22 = vpop.f32.mrf.mxu1 }
 0x5c3   :  { %1102 = vrot.lane.b32.xlu1 %v5208_v22, %s4780_s6 }
 0x5c4   :  { %v4386_v27 = vpop.f32.mrf.mxu1 }
 0x5c5   :  { %v4022_v27 = vld [vmem:[%s5863_s12 + $0x38] sm:$0xff] }
 0x62f   :  { %v1100_v28 = vpop.permute.xlu0 %1099 }
 0x630   :  { %v1109_v30 = vsel %vm179_vm1, 0.0, %v1100_v28  ;;  %v4021_v28 = vld [vmem:[%s5863_s12 + $0x30] sm:$0xff] }
 0x633   :  { %v5212_v29 = vpop.permute.xlu0 %1106 }
 0x635   :  { %v1103_v31 = vpop.permute.xlu1 %1102 }
 0x636   :  { %v1110_v32 = vsel %vm804_vm5, %v1109_v30, %v1103_v31  ;;  %v4020_v30 = vld [vmem:[%s5863_s12 + $0x28] sm:$0xff]  ;;  %v4019_v31 = vld [vmem:[%s5863_s12 + $0x20] sm:$0xff] }
 0x637   :  { %v1112_v33 = vsel %vm1111_vm8, %v1110_v32, %v5212_v29 }
 0x638   :  { %4402 = vmatmul.mubr.msk.f32.vlgmr.msra.gmra.mxu0 %vm1127_vm9, %v1112_v33 }
 0x639   :  { %4419 = vmatpush3.msra.mxu0 %v4943_v3  ;;  %4422 = vmatprep.mubr.msk.f32.mxu0 %vm4775_vm0, %v4774_v1  ;;  %v1206_v3 = vld [vmem:[%s5867_s16] sm:$0xff] }
 0x63a   :  { %4420 = vmatprep.subr.mxu0 %v4774_v1  ;;  %4407 = vmatpush3.msra.mxu1 %v1206_v3 }
 0x63b   :  { %4421 = vmatpush3.msra.mxu0 %v4950_v4  ;;  %4411 = vmatprep.subr.mxu1 %v4774_v1  ;;  %v3989_v4 = vld [vmem:[%s5866_s15] ss:$0 sm:$0xff] }
 0x63c   :  { %4436 = vmatprep.subr.mxu0 %v4774_v1 }
 0x6f8   :  { %v1201_v35 = vpop.f32.mrf.mxu0 }
 0x6f9   :  { %v1202_v36 = vadd.f32 %v3989_v4, %v1201_v35 }
 0x6fa   :  { %v4403_v37 = vpop.f32.mrf.mxu0 }
 0x6fb   :  { %v1205_v38 = vmax.f32 %v1202_v36, 0.0  ;;  %v4016_v36 = vld [vmem:[%s5861_s10 + $0x1] ss:$0 sm:$0xff] }
 0x6fd   :  { %4409 = vmatmul.mubr.msk.f32.vlgmr.msra.gmra.mxu1 %vm179_vm1, %v1205_v38 }
 0x6fe   :  { %4412 = vmatpush3.msra.mxu1 %v4920_v0  ;;  %4415 = vmatprep.mubr.msk.f32.mxu1 %vm4775_vm0, %v4774_v1 }
 0x6ff   :  { %4413 = vmatprep.subr.mxu1 %v4774_v1 }
 0x700   :  { %4414 = vmatpush3.msra.mxu1 %v4926_v2 }
 0x701   :  { %4425 = vmatprep.subr.mxu1 %v4774_v1 }
 0x7bd   :  { %v1284_v40 = vpop.f32.mrf.mxu1 }
 0x7be   :  { %v1285_v41 = vadd.f32 %v3992_v39, %v1284_v40  ;;  %v1862_v39 = vmul.f32 %v4016_v36, %v5101_v50 }
 0x7bf   :  { %v4410_v42 = vpop.f32.mrf.mxu1 }
 0x7c0   :  { %v5246_v43 = vmul.f32 0.1, %v1285_v41  ;;  %v4018_v41 = vld [vmem:[%s5862_s11 + $0x1] ss:$0 sm:$0xff] }
 0x7c2   :  { %4416 = vmatmul.mubr.msk.f32.vlgmr.msra.gmra.mxu1 %vm179_vm1, %v5246_v43 }
 0x7c3   :  { %4427 = vmatprep.mubr.msk.f32.mxu1 %vm4775_vm0, %v4774_v1 }
 0x882   :  { %v1368_v0 = vpop.f32.mrf.mxu1 }
 0x883   :  { %v1369_v2 = vadd.f32 %v4957_v5, %v1368_v0 }
 0x884   :  { %v4417_v44 = vpop.f32.mrf.mxu1 }
 0x885   :  { %v1372_v45 = vmax.f32 %v1369_v2, 0.0 }
 0x887   :  { %4423 = vmatmul.mubr.msk.f32.vlgmr.msra.gmra.mxu0 %vm179_vm1, %v1372_v45 }
 0x888   :  { %4438 = vmatprep.mubr.msk.f32.mxu0 %vm4775_vm0, %v4774_v1 }
 0x947   :  { %v1451_v46 = vpop.f32.mrf.mxu0 }
 0x948   :  { %v5257_v47 = vadd.f32 %v4966_v10, %v1451_v46  ;;  %v4008_v10 = vld [vmem:[%s5898_s29 + $0x18] sm:$0xff]  ;;  %v1863_v46 = vmul.f32 %v4016_v36, %v5097_v48 }
 0x949   :  { %v4424_v51 = vpop.f32.mrf.mxu0 }
 0x94a   :  { %3998 = vst.msk [vmem:[%s5873_s22 + $0x8] sm:$0xff] %vm336_vm2, %v5257_v47  ;;  %1488 = vrot.lane.b32.xlu1 %v5257_v47, %s4777_s7 }
 0x9bc   :  { %v1489_v5 = vpop.permute.xlu1 %1488 }
 0x9bd   :  { %v1491_v53 = vsel %vm179_vm1, %v5246_v43, %v1489_v5 }
 0x9be   :  { %4426 = vmatpush3.msra.mxu1 %v1491_v53  ;;  %4437 = vmatpush3.msra.mxu0 %v1491_v53 }
 0x9bf   :  { %4428 = vmatmul.mubr.msk.f32.vlgmr.msra.gmra.mxu1 %vm373_vm4, %v4991_v18  ;;  %4439 = vmatmul.mubr.msk.f32.vlgmr.msra.gmra.mxu0 %vm373_vm4, %v4996_v19 }
 0x9c0   :  { %4430 = vmatprep.mubr.msk.f32.mxu1 %vm4775_vm0, %v4774_v1  ;;  %4441 = vmatprep.mubr.msk.f32.mxu0 %vm4775_vm0, %v4774_v1 }
 0x9c1   :  { %4447 = vmatprep.subr.mxu1 %v4774_v1  ;;  %4460 = vmatprep.subr.mxu0 %v4774_v1 }
 0x9c2   :  { %4448 = vmatpush3.msra.mxu1 %v4008_v10  ;;  %4461 = vmatpush3.msra.mxu0 %v4006_v54 }
 0x9c3   :  { %4431 = vmatmul.mubr.msk.f32.gmra.mxu1 %vm373_vm4, %v5015_v23  ;;  %4442 = vmatmul.mubr.msk.f32.gmra.mxu0 %vm373_vm4, %v5020_v24 }
 0x9c4   :  { %4433 = vmatprep.mubr.msk.f32.mxu1 %vm4775_vm0, %v4774_v1  ;;  %4444 = vmatprep.mubr.msk.f32.mxu0 %vm4775_vm0, %v4774_v1 }
 0x9c5   :  { %4449 = vmatprep.subr.mxu1 %v4774_v1  ;;  %4462 = vmatprep.subr.mxu0 %v4774_v1 }
 0x9c6   :  { %4450 = vmatpush3.msra.mxu1 %v4007_v55  ;;  %4463 = vmatpush3.msra.mxu0 %v4005_v57 }
 0x9c7   :  { %4434 = vmatmul.mubr.msk.f32.gmra.mxu1 %vm373_vm4, %v5035_v25  ;;  %4445 = vmatmul.mubr.msk.f32.gmra.mxu0 %vm373_vm4, %v5040_v26 }
 0x9c8   :  { %4451 = vmatprep.mubr.msk.f32.mxu1 %vm4775_vm0, %v4774_v1  ;;  %4464 = vmatprep.mubr.msk.f32.mxu0 %vm4775_vm0, %v4774_v1 }
 0x9c9   :  { %4473 = vmatprep.subr.mxu1 %v4774_v1  ;;  %4490 = vmatprep.subr.mxu0 %v4774_v1 }
 0xa7f   :  { %v1558_v59 = vpop.f32.mrf.mxu1  ;;  %v1638_v60 = vpop.f32.mrf.mxu0 }
 0xa80   :  { %4452 = vmatmul.mubr.msk.f32.vlgmr.msra.gmra.mxu1 %vm179_vm1, %v1558_v59  ;;  %4465 = vmatmul.mubr.msk.f32.vlgmr.msra.gmra.mxu0 %vm179_vm1, %v1638_v60  ;;  %v1652_v21 = vsub.f32 %v1638_v60, %v1558_v59  ;;  %v1864_v60 = vmul.f32 %v4016_v36, %v5099_v49 }
 0xa81   :  { %v4429_v62 = vpop.f32.mrf.mxu1  ;;  %v4440_v63 = vpop.f32.mrf.mxu0  ;;  %4454 = vmatprep.mubr.msk.f32.mxu1 %vm4775_vm0, %v4774_v1  ;;  %4467 = vmatprep.mubr.msk.f32.mxu0 %vm4775_vm0, %v4774_v1 }
 0xa82   :  { %4474 = vmatpush3.msra.mxu1 %v4022_v27 }
 0xa83   :  { %v1563_v7 = vpop.f32.mrf.mxu1  ;;  %v1643_v8 = vpop.f32.mrf.mxu0  ;;  %4475 = vmatprep.subr.mxu1 %v4774_v1 }
 0xa84   :  { %v1653_v9 = vsub.f32 %v1643_v8, %v1563_v7  ;;  %4455 = vmatmul.mubr.msk.f32.gmra.mxu1 %vm179_vm1, %v1563_v7  ;;  %4468 = vmatmul.mubr.msk.f32.gmra.mxu0 %vm179_vm1, %v1643_v8 }
 0xa85   :  { %v4432_v11 = vpop.f32.mrf.mxu1  ;;  %v4443_v12 = vpop.f32.mrf.mxu0  ;;  %4457 = vmatprep.mubr.msk.f32.mxu1 %vm4775_vm0, %v4774_v1  ;;  %4470 = vmatprep.mubr.msk.f32.mxu0 %vm4775_vm0, %v4774_v1 }
 0xa86   :  { %1660 = vrot.lane.b32.xlu1 %v1653_v9, %s5883_s1  ;;  %4476 = vmatpush3.msra.mxu1 %v4021_v28 }
 0xa87   :  { %v1568_v13 = vpop.f32.mrf.mxu1  ;;  %v1648_v15 = vpop.f32.mrf.mxu0  ;;  %4477 = vmatprep.subr.mxu1 %v4774_v1 }
 0xa88   :  { %v1654_v16 = vsub.f32 %v1648_v15, %v1568_v13  ;;  %4458 = vmatmul.mubr.msk.f32.gmra.mxu1 %vm179_vm1, %v1568_v13  ;;  %4471 = vmatmul.mubr.msk.f32.gmra.mxu0 %vm179_vm1, %v1648_v15 }
 0xa89   :  { %v4435_v17 = vpop.f32.mrf.mxu1  ;;  %v4446_v20 = vpop.f32.mrf.mxu0  ;;  %4481 = vmatprep.mubr.msk.f32.mxu1 %vm4775_vm0, %v4774_v1  ;;  %4496 = vmatprep.mubr.msk.f32.mxu0 %vm4775_vm0, %v4774_v1 }
 0xa8a   :  { %1662 = vrot.lane.b32.xlu0 %v1654_v16, %s5883_s1  ;;  %4478 = vmatpush3.msra.mxu1 %v4020_v30  ;;  %v4024_v17 = vld [vmem:[%s5864_s13 + $0x1] ss:$0 sm:$0xff] }
 0xa8b   :  { %4479 = vmatprep.subr.mxu1 %v4774_v1 }
 0xa8c   :  { %4480 = vmatpush3.msra.mxu1 %v4019_v31 }
 0xa8d   :  { %4508 = vmatprep.subr.mxu1 %v4774_v1 }
 0xa8e   :  { %1658 = vrot.lane.b32.xlu0 %v1652_v21, %s5883_s1 }
 0xaf8   :  { %v1661_v32 = vpop.permute.xlu1 %1660 }
 0xaf9   :  { %v1668_v33 = vmul.f32 %v1661_v32, %v5112_v56 }
 0xafb   :  { %2071 = vrot.lane.b32.xlu0 %v1668_v33, %s4777_s7 }
 0xafc   :  { %v1663_v34 = vpop.permute.xlu0 %1662 }
 0xafd   :  { %v1669_v3 = vmul.f32 %v1663_v34, %v5119_v58 }
 0xaff   :  { %2073 = vrot.lane.b32.xlu0 %v1669_v3, %s4777_s7 }
 0xb00   :  { %v1659_v4 = vpop.permute.xlu0 %1658 }
 0xb01   :  { %v1667_v35 = vmul.f32 %v1659_v4, %v5106_v52 }
 0xb03   :  { %2069 = vrot.lane.b32.xlu0 %v1667_v35, %s4777_s7 }
 0xb40   :  { %v1751_v37 = vpop.f32.mrf.mxu1  ;;  %v1840_v38 = vpop.f32.mrf.mxu0 }
 0xb41   :  { %v1841_v40 = vadd.f32 %v1840_v38, %v1751_v37 }
 0xb42   :  { %v4453_v42 = vpop.f32.mrf.mxu1  ;;  %v4466_v0 = vpop.f32.mrf.mxu0 }
 0xb43   :  { %v1865_v2 = vadd.f32 %v1862_v39, %v1841_v40  ;;  %v4036_v40 = vld [vmem:[%s5865_s14 + $0x68] sm:$0x7]  ;;  %v4034_v42 = vld [vmem:[%s5865_s14 + $0x58] sm:$0xff]  ;;  %v4033_v0 = vld [vmem:[%s5865_s14 + $0x50] sm:$0xff] }
 0xb44   :  { %v1756_v44 = vpop.f32.mrf.mxu1  ;;  %v1845_v45 = vpop.f32.mrf.mxu0 }
 0xb45   :  { %v1876_v51 = vadd.f32 %v4018_v41, %v1865_v2  ;;  %v1846_v5 = vadd.f32 %v1845_v45, %v1756_v44  ;;  %v4032_v2 = vld [vmem:[%s5865_s14 + $0x48] sm:$0xff]  ;;  %v4031_v44 = vld [vmem:[%s5865_s14 + $0x40] sm:$0xff] }
 0xb46   :  { %v4456_v53 = vpop.f32.mrf.mxu1  ;;  %v4469_v10 = vpop.f32.mrf.mxu0 }
 0xb47   :  { %v1879_v54 = vmax.f32 %v1876_v51, 0.0  ;;  %v1866_v55 = vadd.f32 %v1863_v46, %v1846_v5  ;;  %v4030_v51 = vld [vmem:[%s5865_s14 + $0x38] sm:$0xff] }
 0xb48   :  { %v1761_v57 = vpop.f32.mrf.mxu1  ;;  %v1850_v59 = vpop.f32.mrf.mxu0 }
 0xb49   :  { %v1877_v62 = vadd.f32 %v4018_v41, %v1866_v55  ;;  %v1851_v63 = vadd.f32 %v1850_v59, %v1761_v57  ;;  %4482 = vmatmul.mubr.msk.f32.vlgmr.msra.gmra.mxu1 %vm804_vm5, %v1879_v54 }
 0xb4a   :  { %v4459_v7 = vpop.f32.mrf.mxu1  ;;  %v4472_v8 = vpop.f32.mrf.mxu0  ;;  %4484 = vmatprep.mubr.msk.f32.mxu1 %vm4775_vm0, %v4774_v1  ;;  %4509 = vmatpush3.msk.msra.mxu1 %vm1131_vm7, %v4036_v40  ;;  %v4064_v40 = vld [vmem:[%s5899_s30 + $0x28] sm:$0xff] }
 0xb4b   :  { %v1880_v9 = vmax.f32 %v1877_v62, 0.0  ;;  %v1867_v11 = vadd.f32 %v1864_v60, %v1851_v63  ;;  %4510 = vmatprep.subr.mxu1 %v4774_v1  ;;  %v4042_v60 = vld [vmem:[%s5867_s16 + $0x18] sm:$0xff]  ;;  %v4041_v62 = vld [vmem:[%s5867_s16 + $0x10] sm:$0xff]  ;;  %v4038_v63 = vld [vmem:[%s5866_s15 + $0x1] ss:$0 sm:$0xff] }
 0xb4d   :  { %v1878_v12 = vadd.f32 %v4018_v41, %v1867_v11  ;;  %4485 = vmatmul.mubr.msk.f32.gmra.mxu1 %vm804_vm5, %v1880_v9  ;;  %v4035_v41 = vld [vmem:[%s5865_s14 + $0x60] sm:$0xff] }
 0xb4e   :  { %4487 = vmatprep.mubr.msk.f32.mxu1 %vm4775_vm0, %v4774_v1  ;;  %4511 = vmatpush3.msra.mxu1 %v4035_v41 }
 0xb4f   :  { %v1881_v13 = vmax.f32 %v1878_v12, 0.0  ;;  %4512 = vmatprep.subr.mxu1 %v4774_v1  ;;  %v4047_v12 = vld [vmem:[%s5869_s18 + $0x18] sm:$0xff] }
 0xb50   :  { %4513 = vmatpush3.msra.mxu1 %v4034_v42 }
 0xb51   :  { %4488 = vmatmul.mubr.msk.f32.gmra.mxu1 %vm804_vm5, %v1881_v13  ;;  %4514 = vmatprep.subr.mxu1 %v4774_v1  ;;  %v4046_v13 = vld [vmem:[%s5869_s18 + $0x10] sm:$0xff] }
 0xb52   :  { %4522 = vmatprep.mubr.msk.f32.mxu1 %vm4775_vm0, %v4774_v1  ;;  %4515 = vmatpush3.msra.mxu1 %v4033_v0 }
 0xb53   :  { %4516 = vmatprep.subr.mxu1 %v4774_v1 }
 0xb54   :  { %4517 = vmatpush3.msra.mxu1 %v4032_v2 }
 0xb55   :  { %4518 = vmatprep.subr.mxu1 %v4774_v1 }
 0xb56   :  { %4519 = vmatpush3.msra.mxu1 %v4031_v44 }
 0xb57   :  { %4520 = vmatprep.subr.mxu1 %v4774_v1 }
 0xb58   :  { %4521 = vmatpush3.msra.mxu1 %v4030_v51 }
 0xb59   :  { %4539 = vmatprep.subr.mxu1 %v4774_v1 }
 0xb6d   :  { %v2072_v33 = vpop.permute.xlu0 %2071 }
 0xb71   :  { %v2074_v3 = vpop.permute.xlu0 %2073 }
 0xb75   :  { %v2070_v37 = vpop.permute.xlu0 %2069 }
 0xc09   :  { %v1970_v15 = vpop.f32.mrf.mxu1 }
 0xc0a   :  { %v1971_v32 = vadd.f32 %v4024_v17, %v1970_v15  ;;  %v4044_v15 = vld [vmem:[%s5868_s17 + $0x1] ss:$0 sm:$0xff] }
 0xc0b   :  { %v4483_v16 = vpop.f32.mrf.mxu1 }
 0xc0d   :  { %v1975_v20 = vpop.f32.mrf.mxu1 }
 0xc0e   :  { %v1976_v21 = vadd.f32 %v4024_v17, %v1975_v20 }
 0xc0f   :  { %v4486_v27 = vpop.f32.mrf.mxu1 }
 0xc10   :  { %2059 = vrot.lane.b32.xlu1 %v1976_v21, %s5883_s1 }
 0xc11   :  { %v1980_v28 = vpop.f32.mrf.mxu1 }
 0xc12   :  { %v1981_v30 = vadd.f32 %v4024_v17, %v1980_v28  ;;  %v4052_v28 = vld [vmem:[%s5871_s20 + $0x18] sm:$0xff] }
 0xc13   :  { %v4489_v31 = vpop.f32.mrf.mxu1 }
 0xc14   :  { %2061 = vrot.lane.b32.xlu1 %v1981_v30, %s5883_s1  ;;  %4491 = vmatpush3.msra.mxu0 %v1981_v30  ;;  %v4051_v30 = vld [vmem:[%s5871_s20 + $0x10] sm:$0xff] }
 0xc15   :  { %4492 = vmatprep.subr.mxu0 %v4774_v1 }
 0xc16   :  { %4493 = vmatpush3.msra.mxu0 %v1976_v21 }
 0xc17   :  { %4494 = vmatprep.subr.mxu0 %v4774_v1 }
 0xc18   :  { %2057 = vrot.lane.b32.xlu1 %v1971_v32, %s5883_s1  ;;  %4495 = vmatpush3.msra.mxu0 %v1971_v32 }
 0xc19   :  { %4497 = vmatmul.mubr.msk.f32.vlgmr.msra.gmra.mxu0 %vm894_vm6, %v5157_v61  ;;  %4499 = vmatprep.subr.mxu0 %v4774_v1 }
 0xc1a   :  { %4505 = vmatprep.mubr.msk.f32.mxu0 %vm4775_vm0, %v4774_v1 }
 0xc82   :  { %v2060_v34 = vpop.permute.xlu1 %2059 }
 0xc83   :  { %v2079_v36 = vsel %vm179_vm1, %v2060_v34, %v2072_v33 }
 0xc86   :  { %v2062_v4 = vpop.permute.xlu1 %2061 }
 0xc87   :  { %v2080_v35 = vsel %vm179_vm1, %v2062_v4, %v2074_v3  ;;  %v4054_v3 = vld [vmem:[%s5872_s21 + $0x1] ss:$0 sm:$0xff] }
 0xc88   :  { %4500 = vmatpush3.msra.mxu0 %v2080_v35 }
 0xc89   :  { %4501 = vmatprep.subr.mxu0 %v4774_v1 }
 0xc8a   :  { %v2058_v38 = vpop.permute.xlu1 %2057  ;;  %4502 = vmatpush3.msra.mxu0 %v2079_v36 }
 0xc8b   :  { %v2078_v39 = vsel %vm179_vm1, %v2058_v38, %v2070_v37  ;;  %4503 = vmatprep.subr.mxu0 %v4774_v1 }
 0xc8c   :  { %4504 = vmatpush3.msra.mxu0 %v2078_v39  ;;  %v4066_v39 = vld [vmem:[%s5898_s29 + $0x28] sm:$0xff] }
 0xc8d   :  { %4506 = vmatmul.mubr.msk.f32.vlgmr.msra.gmra.mxu0 %vm894_vm6, %v5166_v6  ;;  %4525 = vmatprep.subr.mxu0 %v4774_v1 }
 0xc8e   :  { %4529 = vmatprep.mubr.msk.f32.mxu0 %vm4775_vm0, %v4774_v1  ;;  %4526 = vmatpush3.msra.mxu0 %v4042_v60  ;;  %v4077_v60 = vld [vmem:[%s5863_s12 + $0x40] sm:$0xff] }
 0xc8f   :  { %4527 = vmatprep.subr.mxu0 %v4774_v1 }
 0xc90   :  { %4528 = vmatpush3.msra.mxu0 %v4041_v62 }
 0xc91   :  { %4532 = vmatprep.subr.mxu0 %v4774_v1 }
 0xcd9   :  { %v2050_v45 = vpop.f32.mrf.mxu0 }
 0xcda   :  { %2182 = vrot.lane.b32.xlu1 %v2050_v45, %s4777_s7 }
 0xcdb   :  { %v4498_v46 = vpop.f32.mrf.mxu0 }
 0xd4c   :  { %v2183_v10 = vpop.permute.xlu1 %2182 }
 0xd4d   :  { %v5424_v5 = vpop.f32.mrf.mxu0  ;;  %v2188_v54 = vsel %vm179_vm1, %v5246_v43, %v2183_v10 }
 0xd4e   :  { %2185 = vrot.lane.b32.xlu0 %v5424_v5, %s4780_s6 }
 0xd4f   :  { %v4507_v53 = vpop.f32.mrf.mxu0 }
 0xdc0   :  { %v2186_v55 = vpop.permute.xlu0 %2185 }
 0xdc1   :  { %v2189_v57 = vsel %vm804_vm5, %v2188_v54, %v2186_v55  ;;  %v4080_v55 = vld [vmem:[%s5863_s12 + $0x58] sm:$0xff] }
 0xdc2   :  { %v2190_v59 = vsel %vm1111_vm8, %v2189_v57, %v5212_v29  ;;  %v4079_v57 = vld [vmem:[%s5863_s12 + $0x50] sm:$0xff] }
 0xdc3   :  { %4523 = vmatmul.mubr.msk.f32.vlgmr.msra.gmra.mxu1 %vm1127_vm9, %v2190_v59  ;;  %v4078_v59 = vld [vmem:[%s5863_s12 + $0x48] sm:$0xff] }
 0xdc4   :  { %4543 = vmatprep.mubr.msk.f32.mxu1 %vm4775_vm0, %v4774_v1  ;;  %4540 = vmatpush3.msra.mxu1 %v4052_v28 }
 0xdc5   :  { %4541 = vmatprep.subr.mxu1 %v4774_v1 }
 0xdc6   :  { %4542 = vmatpush3.msra.mxu1 %v4051_v30 }
 0xdc7   :  { %4557 = vmatprep.subr.mxu1 %v4774_v1 }
 0xe83   :  { %v2279_v7 = vpop.f32.mrf.mxu1 }
 0xe84   :  { %v2280_v8 = vadd.f32 %v4038_v63, %v2279_v7 }
 0xe85   :  { %v4524_v9 = vpop.f32.mrf.mxu1 }
 0xe86   :  { %v2283_v11 = vmax.f32 %v2280_v8, 0.0 }
 0xe88   :  { %4530 = vmatmul.mubr.msk.f32.vlgmr.msra.gmra.mxu0 %vm179_vm1, %v2283_v11 }
 0xe89   :  { %4536 = vmatprep.mubr.msk.f32.mxu0 %vm4775_vm0, %v4774_v1  ;;  %4533 = vmatpush3.msra.mxu0 %v4047_v12  ;;  %v4074_v12 = vld [vmem:[%s5861_s10 + $0x2] ss:$0 sm:$0xff] }
 0xe8a   :  { %4534 = vmatprep.subr.mxu0 %v4774_v1  ;;  %v2947_v30 = vmul.f32 %v4074_v12, %v5097_v48 }
 0xe8b   :  { %4535 = vmatpush3.msra.mxu0 %v4046_v13 }
 0xe8c   :  { %4546 = vmatprep.subr.mxu0 %v4774_v1 }
 0xf48   :  { %v2364_v16 = vpop.f32.mrf.mxu0 }
 0xf49   :  { %v2365_v17 = vadd.f32 %v4044_v15, %v2364_v16 }
 0xf4a   :  { %v4531_v20 = vpop.f32.mrf.mxu0 }
 0xf4b   :  { %v2368_v21 = vmul.f32 0.1, %v2365_v17 }
 0xf4d   :  { %v5462_v27 = vadd.f32 %v2368_v21, %v5246_v43  ;;  %v4049_v43 = vld [vmem:[%s5870_s19 + $0x1] ss:$0 sm:$0xff] }
 0xf4f   :  { %4537 = vmatmul.mubr.msk.f32.vlgmr.msra.gmra.mxu0 %vm179_vm1, %v5462_v27 }
 0xf50   :  { %4548 = vmatprep.mubr.msk.f32.mxu0 %vm4775_vm0, %v4774_v1 }
0x100f   :  { %v2450_v31 = vpop.f32.mrf.mxu0 }
0x1010   :  { %v2451_v32 = vadd.f32 %v4049_v43, %v2450_v31 }
0x1011   :  { %v4538_v33 = vpop.f32.mrf.mxu0 }
0x1012   :  { %v2454_v34 = vmax.f32 %v2451_v32, 0.0 }
0x1014   :  { %4544 = vmatmul.mubr.msk.f32.vlgmr.msra.gmra.mxu1 %vm179_vm1, %v2454_v34 }
0x1015   :  { %4559 = vmatprep.mubr.msk.f32.mxu1 %vm4775_vm0, %v4774_v1 }
0x10d4   :  { %v2535_v4 = vpop.f32.mrf.mxu1 }
0x10d5   :  { %v5485_v35 = vadd.f32 %v4054_v3, %v2535_v4 }
0x10d6   :  { %v4545_v36 = vpop.f32.mrf.mxu1 }
0x10d7   :  { %4056 = vst.msk [vmem:[%s5873_s22 + $0x10] sm:$0xff] %vm336_vm2, %v5485_v35  ;;  %2572 = vrot.lane.b32.xlu1 %v5485_v35, %s4777_s7  ;;  %v2948_v36 = vmul.f32 %v4074_v12, %v5099_v49 }
0x1149   :  { %v2573_v37 = vpop.permute.xlu1 %2572 }
0x114a   :  { %v2575_v38 = vsel %vm179_vm1, %v5462_v27, %v2573_v37 }
0x114b   :  { %4547 = vmatpush3.msra.mxu0 %v2575_v38  ;;  %4558 = vmatpush3.msra.mxu1 %v2575_v38 }
0x114c   :  { %4549 = vmatmul.mubr.msk.f32.vlgmr.msra.gmra.mxu0 %vm373_vm4, %v4991_v18  ;;  %4560 = vmatmul.mubr.msk.f32.vlgmr.msra.gmra.mxu1 %vm373_vm4, %v4996_v19  ;;  %v4065_v18 = vld [vmem:[%s5898_s29 + $0x20] sm:$0xff]  ;;  %s5902_s29 = smov 112  }
0x114d   :  { %4551 = vmatprep.mubr.msk.f32.mxu0 %vm4775_vm0, %v4774_v1  ;;  %4562 = vmatprep.mubr.msk.f32.mxu1 %vm4775_vm0, %v4774_v1  ;;  %v4063_v19 = vld [vmem:[%s5899_s30 + $0x20] sm:$0xff] }
0x114e   :  { %4568 = vmatprep.subr.mxu0 %v4774_v1  ;;  %4581 = vmatprep.subr.mxu1 %v4774_v1 }
0x114f   :  { %4569 = vmatpush3.msra.mxu0 %v4066_v39  ;;  %4582 = vmatpush3.msra.mxu1 %v4064_v40 }
0x1150   :  { %4552 = vmatmul.mubr.msk.f32.gmra.mxu0 %vm373_vm4, %v5015_v23  ;;  %4563 = vmatmul.mubr.msk.f32.gmra.mxu1 %vm373_vm4, %v5020_v24 }
0x1151   :  { %4554 = vmatprep.mubr.msk.f32.mxu0 %vm4775_vm0, %v4774_v1  ;;  %4565 = vmatprep.mubr.msk.f32.mxu1 %vm4775_vm0, %v4774_v1 }
0x1152   :  { %4570 = vmatprep.subr.mxu0 %v4774_v1  ;;  %4583 = vmatprep.subr.mxu1 %v4774_v1 }
0x1153   :  { %4571 = vmatpush3.msra.mxu0 %v4065_v18  ;;  %4584 = vmatpush3.msra.mxu1 %v4063_v19 }
0x1154   :  { %4555 = vmatmul.mubr.msk.f32.gmra.mxu0 %vm373_vm4, %v5035_v25  ;;  %4566 = vmatmul.mubr.msk.f32.gmra.mxu1 %vm373_vm4, %v5040_v26 }
0x1155   :  { %4572 = vmatprep.mubr.msk.f32.mxu0 %vm4775_vm0, %v4774_v1  ;;  %4585 = vmatprep.mubr.msk.f32.mxu1 %vm4775_vm0, %v4774_v1 }
0x1156   :  { %4594 = vmatprep.subr.mxu0 %v4774_v1  ;;  %4611 = vmatprep.subr.mxu1 %v4774_v1 }
0x120c   :  { %v2642_v23 = vpop.f32.mrf.mxu0  ;;  %v2722_v24 = vpop.f32.mrf.mxu1 }
0x120d   :  { %4573 = vmatmul.mubr.msk.f32.vlgmr.msra.gmra.mxu0 %vm179_vm1, %v2642_v23  ;;  %4586 = vmatmul.mubr.msk.f32.vlgmr.msra.gmra.mxu1 %vm179_vm1, %v2722_v24  ;;  %v2736_v54 = vsub.f32 %v2722_v24, %v2642_v23 }
0x120e   :  { %v4550_v25 = vpop.f32.mrf.mxu0  ;;  %v4561_v26 = vpop.f32.mrf.mxu1  ;;  %4575 = vmatprep.mubr.msk.f32.mxu0 %vm4775_vm0, %v4774_v1  ;;  %4588 = vmatprep.mubr.msk.f32.mxu1 %vm4775_vm0, %v4774_v1 }
0x120f   :  { %4595 = vmatpush3.msra.mxu0 %v4080_v55  ;;  %v4082_v25 = vld [vmem:[%s5864_s13 + $0x2] ss:$0 sm:$0xff]  ;;  %s4784_s13 = smov [#allocation4]  }
0x1210   :  { %v2647_v41 = vpop.f32.mrf.mxu0  ;;  %v2727_v42 = vpop.f32.mrf.mxu1  ;;  %4596 = vmatprep.subr.mxu0 %v4774_v1 }
0x1211   :  { %v2737_v0 = vsub.f32 %v2727_v42, %v2647_v41  ;;  %4576 = vmatmul.mubr.msk.f32.gmra.mxu0 %vm179_vm1, %v2647_v41  ;;  %4589 = vmatmul.mubr.msk.f32.gmra.mxu1 %vm179_vm1, %v2727_v42 }
0x1212   :  { %v4553_v2 = vpop.f32.mrf.mxu0  ;;  %v4564_v44 = vpop.f32.mrf.mxu1  ;;  %4578 = vmatprep.mubr.msk.f32.mxu0 %vm4775_vm0, %v4774_v1  ;;  %4591 = vmatprep.mubr.msk.f32.mxu1 %vm4775_vm0, %v4774_v1 }
0x1213   :  { %2744 = vrot.lane.b32.xlu1 %v2737_v0, %s5902_s29  ;;  %4597 = vmatpush3.msra.mxu0 %v4079_v57 }
0x1214   :  { %v2652_v45 = vpop.f32.mrf.mxu0  ;;  %v2732_v46 = vpop.f32.mrf.mxu1  ;;  %4598 = vmatprep.subr.mxu0 %v4774_v1 }
0x1215   :  { %v2738_v51 = vsub.f32 %v2732_v46, %v2652_v45  ;;  %4579 = vmatmul.mubr.msk.f32.gmra.mxu0 %vm179_vm1, %v2652_v45  ;;  %4592 = vmatmul.mubr.msk.f32.gmra.mxu1 %vm179_vm1, %v2732_v46 }
0x1216   :  { %v4556_v53 = vpop.f32.mrf.mxu0  ;;  %v4567_v10 = vpop.f32.mrf.mxu1  ;;  %4602 = vmatprep.mubr.msk.f32.mxu0 %vm4775_vm0, %v4774_v1  ;;  %4617 = vmatprep.mubr.msk.f32.mxu1 %vm4775_vm0, %v4774_v1 }
0x1217   :  { %2746 = vrot.lane.b32.xlu0 %v2738_v51, %s5902_s29  ;;  %4599 = vmatpush3.msra.mxu0 %v4078_v59 }
0x1218   :  { %4600 = vmatprep.subr.mxu0 %v4774_v1 }
0x1219   :  { %4601 = vmatpush3.msra.mxu0 %v4077_v60  ;;  %v5625_v60 = vld [vmem:[%s5903_s26] sm:$0xff] }
0x121a   :  { %4629 = vmatprep.subr.mxu0 %v4774_v1 }
0x121b   :  { %2742 = vrot.lane.b32.xlu0 %v2736_v54, %s5902_s29 }
0x1285   :  { %v2745_v62 = vpop.permute.xlu1 %2744 }
0x1286   :  { %v2752_v63 = vmul.f32 %v2745_v62, %v5112_v56  ;;  %v2946_v56 = vmul.f32 %v4074_v12, %v5101_v50  ;;  %v4091_v12 = vld [vmem:[%s5865_s14 + $0x88] sm:$0xff] }
0x1288   :  { %3155 = vrot.lane.b32.xlu0 %v2752_v63, %s4777_s7  ;;  %v158_v63 = vsub.f32 0.0, %v5625_v60 }
0x1289   :  { %v2747_v7 = vpop.permute.xlu0 %2746 }
0x128a   :  { %v2753_v8 = vmul.f32 %v2747_v7, %v5119_v58  ;;  %v4076_v58 = vld [vmem:[%s5862_s11 + $0x2] ss:$0 sm:$0xff] }
0x128c   :  { %3157 = vrot.lane.b32.xlu0 %v2753_v8, %s4777_s7  ;;  %v4094_v8 = vld [vmem:[%s5865_s14 + $0xa0] sm:$0x7] }
0x128d   :  { %v2743_v9 = vpop.permute.xlu0 %2742 }
0x128e   :  { %v2751_v11 = vmul.f32 %v2743_v9, %v5106_v52  ;;  %v4093_v9 = vld [vmem:[%s5865_s14 + $0x98] sm:$0xff] }
0x1290   :  { %3153 = vrot.lane.b32.xlu0 %v2751_v11, %s4777_s7  ;;  %v4092_v11 = vld [vmem:[%s5865_s14 + $0x90] sm:$0xff] }
0x12cd   :  { %v2835_v13 = vpop.f32.mrf.mxu0  ;;  %v2924_v15 = vpop.f32.mrf.mxu1 }
0x12ce   :  { %v2925_v16 = vadd.f32 %v2924_v15, %v2835_v13  ;;  %v4090_v13 = vld [vmem:[%s5865_s14 + $0x80] sm:$0xff]  ;;  %v4089_v15 = vld [vmem:[%s5865_s14 + $0x78] sm:$0xff] }
0x12cf   :  { %v4574_v17 = vpop.f32.mrf.mxu0  ;;  %v4587_v20 = vpop.f32.mrf.mxu1 }
0x12d0   :  { %v2949_v21 = vadd.f32 %v2946_v56, %v2925_v16  ;;  %v4088_v56 = vld [vmem:[%s5865_s14 + $0x70] sm:$0xff] }
0x12d1   :  { %v2840_v28 = vpop.f32.mrf.mxu0  ;;  %v2929_v52 = vpop.f32.mrf.mxu1 }
0x12d2   :  { %v2960_v43 = vadd.f32 %v4076_v58, %v2949_v21  ;;  %v2930_v31 = vadd.f32 %v2929_v52, %v2840_v28  ;;  %v157_v21 = vsub.f32 1.0, %v5625_v60 }
0x12d3   :  { %v4577_v32 = vpop.f32.mrf.mxu0  ;;  %v4590_v33 = vpop.f32.mrf.mxu1 }
0x12d4   :  { %v2963_v34 = vmax.f32 %v2960_v43, 0.0  ;;  %v2950_v3 = vadd.f32 %v2947_v30, %v2930_v31 }
0x12d5   :  { %v2845_v4 = vpop.f32.mrf.mxu0  ;;  %v2934_v50 = vpop.f32.mrf.mxu1 }
0x12d6   :  { %v2961_v37 = vadd.f32 %v4076_v58, %v2950_v3  ;;  %v2935_v38 = vadd.f32 %v2934_v50, %v2845_v4  ;;  %4603 = vmatmul.mubr.msk.f32.vlgmr.msra.gmra.mxu0 %vm804_vm5, %v2963_v34 }
0x12d7   :  { %v4580_v39 = vpop.f32.mrf.mxu0  ;;  %v4593_v40 = vpop.f32.mrf.mxu1  ;;  %4605 = vmatprep.mubr.msk.f32.mxu0 %vm4775_vm0, %v4774_v1  ;;  %4630 = vmatpush3.msk.msra.mxu0 %vm1131_vm7, %v4094_v8 }
0x12d8   :  { %v2964_v48 = vmax.f32 %v2961_v37, 0.0  ;;  %v2951_v18 = vadd.f32 %v2948_v36, %v2935_v38  ;;  %4631 = vmatprep.subr.mxu0 %v4774_v1 }
0x12d9   :  { %4632 = vmatpush3.msra.mxu0 %v4093_v9 }
0x12da   :  { %v2962_v19 = vadd.f32 %v4076_v58, %v2951_v18  ;;  %4606 = vmatmul.mubr.msk.f32.gmra.mxu0 %vm804_vm5, %v2964_v48  ;;  %4633 = vmatprep.subr.mxu0 %v4774_v1  ;;  %v5691_v18 = vld [vmem:[%s5904_s5] sm:$0xff] }
0x12db   :  { %4608 = vmatprep.mubr.msk.f32.mxu0 %vm4775_vm0, %v4774_v1  ;;  %4634 = vmatpush3.msra.mxu0 %v4092_v11 }
0x12dc   :  { %v2965_v23 = vmax.f32 %v2962_v19, 0.0  ;;  %4635 = vmatprep.subr.mxu0 %v4774_v1  ;;  %v338_v19 = vsub.f32 %v4972_v14, %v5691_v18 }
0x12dd   :  { %4636 = vmatpush3.msra.mxu0 %v4091_v12 }
0x12de   :  { %4609 = vmatmul.mubr.msk.f32.gmra.mxu0 %vm804_vm5, %v2965_v23  ;;  %4637 = vmatprep.subr.mxu0 %v4774_v1  ;;  %v5695_v23 = vmul.f32 %v338_v19, %v338_v19 }
0x12df   :  { %4643 = vmatprep.mubr.msk.f32.mxu0 %vm4775_vm0, %v4774_v1  ;;  %4638 = vmatpush3.msra.mxu0 %v4090_v13  ;;  %v4110_v13 = vld [vmem:[%s5871_s20 + $0x28] sm:$0xff] }
0x12e0   :  { %4639 = vmatprep.subr.mxu0 %v4774_v1 }
0x12e1   :  { %4640 = vmatpush3.msra.mxu0 %v4089_v15  ;;  %v4109_v15 = vld [vmem:[%s5871_s20 + $0x20] sm:$0xff] }
0x12e2   :  { %4641 = vmatprep.subr.mxu0 %v4774_v1 }
0x12e3   :  { %4642 = vmatpush3.msra.mxu0 %v4088_v56 }
0x12e4   :  { %4660 = vmatprep.subr.mxu0 %v4774_v1 }
0x12fa   :  { %v3156_v46 = vpop.permute.xlu0 %3155 }
0x12fe   :  { %v3158_v53 = vpop.permute.xlu0 %3157 }
0x1302   :  { %v3154_v57 = vpop.permute.xlu0 %3153 }
0x1396   :  { %v3054_v49 = vpop.f32.mrf.mxu0 }
0x1397   :  { %v3055_v45 = vadd.f32 %v4082_v25, %v3054_v49  ;;  %v1457_v49 = vsub.f32 %v5257_v47, %v5691_v18 }
0x1398   :  { %v4604_v24 = vpop.f32.mrf.mxu0 }
0x1399   :  { %v340_v24 = vsel %vm336_vm2, %v5695_v23, 0.0 }
0x139a   :  { %v3059_v26 = vpop.f32.mrf.mxu0 }
0x139b   :  { %v3060_v41 = vadd.f32 %v4082_v25, %v3059_v26 }
0x139c   :  { %v4607_v42 = vpop.f32.mrf.mxu0 }
0x139d   :  { %3143 = vrot.lane.b32.xlu1 %v3060_v41, %s5902_s29 }
0x139e   :  { %v3064_v0 = vpop.f32.mrf.mxu0 }
0x139f   :  { %v3065_v2 = vadd.f32 %v4082_v25, %v3064_v0  ;;  %v5701_v25 = vmul.f32 %v1457_v49, %v1457_v49 }
0x13a0   :  { %v4610_v44 = vpop.f32.mrf.mxu0 }
0x13a1   :  { %3145 = vrot.lane.b32.xlu1 %v3065_v2, %s5902_s29  ;;  %4612 = vmatpush3.msra.mxu1 %v3065_v2  ;;  %v1459_v26 = vsel %vm336_vm2, %v5701_v25, 0.0  ;;  %v4096_v44 = vld [vmem:[%s5866_s15 + $0x2] ss:$0 sm:$0xff] }
0x13a2   :  { %4613 = vmatprep.subr.mxu1 %v4774_v1 }
0x13a3   :  { %4614 = vmatpush3.msra.mxu1 %v3060_v41  ;;  %v4100_v41 = vld [vmem:[%s5867_s16 + $0x28] sm:$0xff] }
0x13a4   :  { %4615 = vmatprep.subr.mxu1 %v4774_v1 }
0x13a5   :  { %3141 = vrot.lane.b32.xlu1 %v3055_v45, %s5902_s29  ;;  %4616 = vmatpush3.msra.mxu1 %v3055_v45  ;;  %s4782_s29 = smov 113  }
0x13a6   :  { %4618 = vmatmul.mubr.msk.f32.vlgmr.msra.gmra.mxu1 %vm894_vm6, %v5157_v61  ;;  %4620 = vmatprep.subr.mxu1 %v4774_v1 }
0x13a7   :  { %4626 = vmatprep.mubr.msk.f32.mxu1 %vm4775_vm0, %v4774_v1 }
0x140f   :  { %v3144_v51 = vpop.permute.xlu1 %3143 }
0x1410   :  { %v3163_v55 = vsel %vm179_vm1, %v3144_v51, %v3156_v46 }
0x1413   :  { %v3146_v10 = vpop.permute.xlu1 %3145 }
0x1414   :  { %v3164_v54 = vsel %vm179_vm1, %v3146_v10, %v3158_v53 }
0x1415   :  { %4621 = vmatpush3.msra.mxu1 %v3164_v54 }
0x1416   :  { %4622 = vmatprep.subr.mxu1 %v4774_v1 }
0x1417   :  { %v3142_v59 = vpop.permute.xlu1 %3141  ;;  %4623 = vmatpush3.msra.mxu1 %v3163_v55 }
0x1418   :  { %v3162_v61 = vsel %vm179_vm1, %v3142_v59, %v3154_v57  ;;  %4624 = vmatprep.subr.mxu1 %v4774_v1 }
0x1419   :  { %4625 = vmatpush3.msra.mxu1 %v3162_v61  ;;  %v4105_v61 = vld [vmem:[%s5869_s18 + $0x28] sm:$0xff] }
0x141a   :  { %4627 = vmatmul.mubr.msk.f32.vlgmr.msra.gmra.mxu1 %vm894_vm6, %v5166_v6  ;;  %4646 = vmatprep.subr.mxu1 %v4774_v1 }
0x141b   :  { %4650 = vmatprep.mubr.msk.f32.mxu1 %vm4775_vm0, %v4774_v1  ;;  %4647 = vmatpush3.msra.mxu1 %v4100_v41  ;;  %v4743_v41 = vld [vmem:[%s5900_s4 + $0x10] sm:$0xff] }
0x141c   :  { %4648 = vmatprep.subr.mxu1 %v4774_v1 }
0x1466   :  { %v3134_v62 = vpop.f32.mrf.mxu1 }
0x1467   :  { %3266 = vrot.lane.b32.xlu1 %v3134_v62, %s4777_s7  ;;  %v4104_v62 = vld [vmem:[%s5869_s18 + $0x20] sm:$0xff] }
0x1468   :  { %v4619_v7 = vpop.f32.mrf.mxu1 }
0x146b   :  { %160 = vrot.lane.b32.xlu1 %v158_v63, %s4781_s2  ;;  %v4102_v63 = vld [vmem:[%s5868_s17 + $0x2] ss:$0 sm:$0xff] }
0x146f   :  { %1068 = vrot.lane.b32.xlu1 %v4972_v14, %s4781_s2  ;;  %v4099_v14 = vld [vmem:[%s5867_s16 + $0x20] sm:$0xff] }
0x1470   :  { %4649 = vmatpush3.msra.mxu1 %v4099_v14 }
0x1471   :  { %4653 = vmatprep.subr.mxu1 %v4774_v1 }
0x1473   :  { %3235 = vrot.lane.b32.xlu1 %v5485_v35, %s4781_s2 }
0x1477   :  { %1074 = vrot.lane.b32.xlu1 %v5208_v22, %s4782_s29 }
0x14d9   :  { %v3267_v22 = vpop.permute.xlu1 %3266 }
0x14da   :  { %v3231_v16 = vpop.f32.mrf.mxu1  ;;  %v3272_v28 = vsel %vm179_vm1, %v5462_v27, %v3267_v22 }
0x14db   :  { %3269 = vrot.lane.b32.xlu0 %v3231_v16, %s4780_s6  ;;  %3241 = vrot.lane.b32.xlu1 %v3231_v16, %s4782_s29  ;;  %s4786_s6 = smov [#allocation2]  }
0x14dc   :  { %v4628_v58 = vpop.f32.mrf.mxu1 }
0x14dd   :  { %v161_v17 = vpop.permute.xlu1 %160 }
0x14de   :  { %v163_v32 = vmul.f32 %v161_v17, %v157_v21  ;;  %v4112_v17 = vld [vmem:[%s5872_s21 + $0x2] ss:$0 sm:$0xff] }
0x14df   :  { %165 = vrot.lane.b32.xlu0 %v5625_v60, %s4783_s28 }
0x14e1   :  { %v1069_v20 = vpop.permute.xlu1 %1068 }
0x14e2   :  { %v1071_v34 = vmul.f32 %v1069_v20, %v5625_v60 }
0x14e3   :  { %2151 = vrot.lane.b32.xlu0 %v5257_v47, %s4781_s2 }
0x14e5   :  { %v3236_v43 = vpop.permute.xlu1 %3235 }
0x14e6   :  { %v3238_v3 = vmul.f32 %v3236_v43, %v5625_v60  ;;  %v4739_v43 = vld [vmem:[%s5896_s27 + $0x8] sm:$0xff] }
0x14e7   :  { %2157 = vrot.lane.b32.xlu0 %v5424_v5, %s4782_s29 }
0x14e9   :  { %v1075_v50 = vpop.permute.xlu1 %1074 }
0x154d   :  { %v3270_v52 = vpop.permute.xlu0 %3269  ;;  %v3242_v38 = vpop.permute.xlu1 %3241 }
0x154e   :  { %v3273_v30 = vsel %vm804_vm5, %v3272_v28, %v3270_v52  ;;  %v4737_v52 = vld [vmem:[%s5896_s27] sm:$0xff] }
0x154f   :  { %v3274_v31 = vsel %vm1111_vm8, %v3273_v30, %v5212_v29  ;;  %v4738_v30 = vld [vmem:[%s5897_s9] sm:$0xff] }
0x1550   :  { %4644 = vmatmul.mubr.msk.f32.vlgmr.msra.gmra.mxu0 %vm1127_vm9, %v3274_v31  ;;  %v4740_v31 = vld [vmem:[%s5897_s9 + $0x8] sm:$0xff] }
0x1551   :  { %v166_v33 = vpop.permute.xlu0 %165  ;;  %4664 = vmatprep.mubr.msk.f32.mxu0 %vm4775_vm0, %v4774_v1  ;;  %4661 = vmatpush3.msra.mxu0 %v4110_v13 }
0x1552   :  { %v168_v5 = vmul.f32 %v166_v33, %v5625_v60  ;;  %4662 = vmatprep.subr.mxu0 %v4774_v1  ;;  %v4742_v33 = vld [vmem:[%s5897_s9 + $0x10] sm:$0xff] }
0x1553   :  { %4663 = vmatpush3.msra.mxu0 %v4109_v15 }
0x1554   :  { %v5682_v4 = vsub.f32 %v163_v32, %v168_v5  ;;  %4678 = vmatprep.subr.mxu0 %v4774_v1  ;;  %v4741_v32 = vld [vmem:[%s5896_s27 + $0x10] sm:$0xff]  ;;  %s4785_s27 = smov [#allocation6]  }
0x1556   :  { %v1072_v36 = vadd.f32 %v1071_v34, %v5682_v4  ;;  %v3239_v29 = vadd.f32 %v3238_v3, %v5682_v4 }
0x1558   :  { %v1077_v37 = vadd.f32 %v1075_v50, %v1072_v36  ;;  %v3244_v40 = vadd.f32 %v3242_v38, %v3239_v29 }
0x155a   :  { %v1078_v39 = vmul.f32 %v1077_v37, %v1077_v37  ;;  %v3245_v48 = vmul.f32 %v3244_v40, %v3244_v40 }
0x155c   :  { %1080 = vrot.lane.b32.xlu1 %v1078_v39, %s4783_s28 }
0x1560   :  { %3247 = vrot.lane.b32.xlu1 %v3245_v48, %s4783_s28 }
0x1584   :  { %341 = vadd.xlane.f32.xlu1 %v340_v24 }
0x1588   :  { %1460 = vadd.xlane.f32.xlu1 %v1459_v26 }
0x15ce   :  { %v5713_v47 = vpop.permute.xlu1 %1080 }
0x15d2   :  { %v5715_v42 = vpop.permute.xlu1 %3247 }
0x160d   :  { %v342_v0 = vpop.xlane.xlu1 %341 }
0x160e   :  { %v343_v2 = vrot.slane %v342_v0, 4 }
0x1610   :  { %v344_v45 = vadd.f32 %v343_v2, %v342_v0  ;;  %v3363_v46 = vpop.f32.mrf.mxu0  ;;  %v4744_v0 = vld [vmem:[%s5900_s4 + $0x8] sm:$0xff] }
0x1611   :  { %v3364_v51 = vadd.f32 %v4096_v44, %v3363_v46  ;;  %v4745_v44 = vld [vmem:[%s5900_s4] sm:$0xff]  ;;  %v2152_v46 = vpop.permute.xlu0 %2151 }
0x1612   :  { %v345_v53 = vrot.slane %v344_v45, 2  ;;  %v4645_v10 = vpop.f32.mrf.mxu0 }
0x1613   :  { %v3367_v54 = vmax.f32 %v3364_v51, 0.0  ;;  %v2154_v51 = vmul.f32 %v2152_v46, %v5625_v60 }
0x1614   :  { %v346_v55 = vadd.f32 %v345_v53, %v344_v45 }
0x1615   :  { %4651 = vmatmul.mubr.msk.f32.vlgmr.msra.gmra.mxu1 %vm179_vm1, %v3367_v54  ;;  %v2155_v53 = vadd.f32 %v2154_v51, %v5682_v4  ;;  %v2158_v10 = vpop.permute.xlu0 %2157 }
0x1616   :  { %v347_v57 = vrot.slane %v346_v55, 1  ;;  %4657 = vmatprep.mubr.msk.f32.mxu1 %vm4775_vm0, %v4774_v1  ;;  %4654 = vmatpush3.msra.mxu1 %v4105_v61 }
0x1617   :  { %4655 = vmatprep.subr.mxu1 %v4774_v1  ;;  %v2160_v54 = vadd.f32 %v2158_v10, %v2155_v53 }
0x1618   :  { %v348_v59 = vadd.f32 %v347_v57, %v346_v55  ;;  %4656 = vmatpush3.msra.mxu1 %v4104_v62 }
0x1619   :  { %4667 = vmatprep.subr.mxu1 %v4774_v1 }
0x161a   :  { %4698 = vpush %v348_v59  ;;  %v2161_v59 = vmul.f32 %v2160_v54, %v2160_v54 }
0x164b   :  { %s4699_s16 = spop %4698 }
0x164c   :  { %s352_s10 = smul.f32 0.125, %s4699_s16 }
0x164e   :  { %354 = sst [smem:[#allocation4]] %s352_s10 }
0x16d5   :  { %v3448_v7 = vpop.f32.mrf.mxu1 }
0x16d6   :  { %v3449_v8 = vadd.f32 %v4102_v63, %v3448_v7 }
0x16d7   :  { %v4652_v9 = vpop.f32.mrf.mxu1 }
0x16d8   :  { %v3452_v11 = vmul.f32 0.1, %v3449_v8 }
0x16da   :  { %v3453_v12 = vadd.f32 %v3452_v11, %v5462_v27  ;;  %v4107_v27 = vld [vmem:[%s5870_s19 + $0x2] ss:$0 sm:$0xff] }
0x16dc   :  { %4658 = vmatmul.mubr.msk.f32.vlgmr.msra.gmra.mxu1 %vm179_vm1, %v3453_v12 }
0x16dd   :  { %4669 = vmatprep.mubr.msk.f32.mxu1 %vm4775_vm0, %v4774_v1 }
0x179c   :  { %v3534_v56 = vpop.f32.mrf.mxu1 }
0x179d   :  { %v3535_v16 = vadd.f32 %v4107_v27, %v3534_v56 }
0x179e   :  { %v4659_v58 = vpop.f32.mrf.mxu1 }
0x179f   :  { %v3538_v22 = vmax.f32 %v3535_v16, 0.0  ;;  %v1083_v58 = vsel %vm336_vm2, %v5713_v47, 0.0 }
0x17a1   :  { %4665 = vmatmul.mubr.msk.f32.vlgmr.msra.gmra.mxu0 %vm179_vm1, %v3538_v22 }
0x17a2   :  { %4680 = vmatprep.mubr.msk.f32.mxu0 %vm4775_vm0, %v4774_v1 }
0x1861   :  { %v3619_v20 = vpop.f32.mrf.mxu0 }
0x1862   :  { %v5755_v21 = vadd.f32 %v4112_v17, %v3619_v20  ;;  %v3250_v20 = vsel %vm336_vm2, %v5715_v42, 0.0 }
0x1863   :  { %v4666_v28 = vpop.f32.mrf.mxu0 }
0x1864   :  { %4114 = vst.msk [vmem:[%s5873_s22 + $0x18] sm:$0xff] %vm336_vm2, %v5755_v21  ;;  %4668 = vmatpush3.msra.mxu1 %v5755_v21  ;;  %4679 = vmatpush3.msra.mxu0 %v5755_v21 }
0x1865   :  { %3892 = vrot.lane.b32.xlu0 %v5755_v21, %s4781_s2  ;;  %4670 = vmatmul.mubr.msk.f32.vlgmr.msra.gmra.mxu1 %vm373_vm4, %v4737_v52 }
0x1866   :  { %4681 = vmatmul.mubr.msk.f32.vlgmr.msra.gmra.mxu0 %vm373_vm4, %v4738_v30  ;;  %4672 = vmatprep.mubr.msk.f32.mxu1 %vm4775_vm0, %v4774_v1 }
0x1867   :  { %4683 = vmatprep.mubr.msk.f32.mxu0 %vm4775_vm0, %v4774_v1  ;;  %4689 = vmatprep.subr.mxu1 %v4774_v1 }
0x1869   :  { %4673 = vmatmul.mubr.msk.f32.gmra.mxu1 %vm373_vm4, %v4739_v43 }
0x186a   :  { %4684 = vmatmul.mubr.msk.f32.gmra.mxu0 %vm373_vm4, %v4740_v31  ;;  %4675 = vmatprep.mubr.msk.f32.mxu1 %vm4775_vm0, %v4774_v1 }
0x186b   :  { %4686 = vmatprep.mubr.msk.f32.mxu0 %vm4775_vm0, %v4774_v1 }
0x186d   :  { %4676 = vmatmul.mubr.msk.f32.gmra.mxu1 %vm373_vm4, %v4741_v32 }
0x186e   :  { %4687 = vmatmul.mubr.msk.f32.gmra.mxu0 %vm373_vm4, %v4742_v33  ;;  %4695 = vmatprep.mubr.msk.f32.mxu1 %vm4775_vm0, %v4774_v1 }
0x18d7   :  { %v3893_v61 = vpop.permute.xlu0 %3892 }
0x1925   :  { %v3721_v5 = vpop.f32.mrf.mxu1 }
0x1926   :  { %v3801_v34 = vpop.f32.mrf.mxu0 }
0x1927   :  { %v4671_v3 = vpop.f32.mrf.mxu1  ;;  %v3815_v26 = vsub.f32 %v3801_v34, %v3721_v5 }
0x1928   :  { %v4682_v50 = vpop.f32.mrf.mxu0 }
0x1929   :  { %v3726_v36 = vpop.f32.mrf.mxu1  ;;  %v3818_v45 = vmul.f32 %v4745_v44, %v3815_v26 }
0x192a   :  { %v3806_v29 = vpop.f32.mrf.mxu0 }
0x192b   :  { %v4674_v37 = vpop.f32.mrf.mxu1  ;;  %v3816_v48 = vsub.f32 %v3806_v29, %v3726_v36 }
0x192c   :  { %v4685_v38 = vpop.f32.mrf.mxu0 }
0x192d   :  { %v3731_v39 = vpop.f32.mrf.mxu1  ;;  %v3819_v2 = vmul.f32 %v4744_v0, %v3816_v48 }
0x192e   :  { %v3811_v40 = vpop.f32.mrf.mxu0 }
0x192f   :  { %v3817_v19 = vsub.f32 %v3811_v40, %v3731_v39  ;;  %v4677_v49 = vpop.f32.mrf.mxu1 }
0x1930   :  { %v4688_v24 = vpop.f32.mrf.mxu0 }
0x1931   :  { %v3820_v14 = vmul.f32 %v4743_v41, %v3817_v19 }
0x1933   :  { %4690 = vmatpush3.msra.mxu1 %v3820_v14 }
0x1934   :  { %4691 = vmatprep.subr.mxu1 %v4774_v1 }
0x1935   :  { %4692 = vmatpush3.msra.mxu1 %v3819_v2 }
0x1936   :  { %4693 = vmatprep.subr.mxu1 %v4774_v1  ;;  %v3895_v1 = vmul.f32 %v3893_v61, %v5625_v60  ;;  %v3625_v60 = vsub.f32 %v5755_v21, %v5691_v18 }
0x1937   :  { %4694 = vmatpush3.msra.mxu1 %v3818_v45 }
0x1938   :  { %4696 = vmatmul.mubr.msk.f32.vlgmr.msra.gmra.mxu1 %vm894_vm6, %v5166_v6  ;;  %v2541_v6 = vsub.f32 %v5485_v35, %v5691_v18  ;;  %v3896_v62 = vadd.f32 %v3895_v1, %v5682_v4  ;;  %v3626_v4 = vmul.f32 %v3625_v60, %v3625_v60 }
0x193a   :  { %v2542_v8 = vmul.f32 %v2541_v6, %v2541_v6  ;;  %v3627_v27 = vsel %vm336_vm2, %v3626_v4, 0.0 }
0x193c   :  { %v2543_v17 = vsel %vm336_vm2, %v2542_v8, 0.0 }
0x19f8   :  { %v3887_v55 = vpop.f32.mrf.mxu1 }
0x19f9   :  { %3898 = vrot.lane.b32.xlu0 %v3887_v55, %s4781_s2  ;;  %s5905_s2 = sld [smem:[#allocation16_spill]] }
0x19fa   :  { %v4697_v57 = vpop.f32.mrf.mxu1 }
0x19fd   :  { %2163 = vrot.lane.b32.xlu0 %v2161_v59, %s4783_s28 }
0x19ff   :  { %v92_v12 = vld [vmem:[%s5905_s2] sm:$0xff] }
0x1a00   :  { %v2558_v15 = vmul.f32 %v2542_v8, %v92_v12  ;;  %v355_v56 = vmul.f32 %v5695_v23, %v92_v12  ;;  %v1474_v22 = vmul.f32 %v5701_v25, %v92_v12  ;;  %v3642_v21 = vmul.f32 %v3626_v4, %v92_v12  ;;  %v1461_v25 = vpop.xlane.xlu1 %1460 }
0x1a01   :  { %v1462_v30 = vrot.slane %v1461_v25, 4 }
0x1a02   :  { %v2559_v35 = vsel %vm336_vm2, %v2558_v15, 0.0  ;;  %v356_v16 = vsel %vm336_vm2, %v355_v56, 0.0  ;;  %v1475_v18 = vsel %vm336_vm2, %v1474_v22, 0.0  ;;  %v3643_v23 = vsel %vm336_vm2, %v3642_v21, 0.0 }
0x1a03   :  { %v1463_v31 = vadd.f32 %v1462_v30, %v1461_v25 }
0x1a05   :  { %v1464_v3 = vrot.slane %v1463_v31, 2 }
0x1a07   :  { %v1465_v26 = vadd.f32 %v1464_v3, %v1463_v31 }
0x1a09   :  { %v1466_v10 = vrot.slane %v1465_v26, 1 }
0x1a6b   :  { %v3899_v63 = vpop.permute.xlu0 %3898 }
0x1a6c   :  { %v3901_v7 = vadd.f32 %v3899_v63, %v3896_v62 }
0x1a6e   :  { %v3902_v9 = vmul.f32 %v3901_v7, %v3901_v7  ;;  %v1467_v7 = vadd.f32 %v1466_v10, %v1465_v26 }
0x1a6f   :  { %v2164_v11 = vpop.permute.xlu0 %2163 }
0x1a70   :  { %3904 = vrot.lane.b32.xlu0 %v3902_v9, %s4783_s28  ;;  %v2166_v13 = vsel %vm336_vm2, %v2164_v11, 0.0 }
0x1a71   :  { %2167 = vadd.xlane.f32.xlu1 %v2166_v13 }
0x1a75   :  { %2560 = vadd.xlane.f32.xlu1 %v2559_v35 }
0x1a79   :  { %3628 = vadd.xlane.f32.xlu1 %v3627_v27 }
0x1a8f   :  { %357 = vadd.xlane.f32.xlu0 %v356_v16 }
0x1a93   :  { %1084 = vadd.xlane.f32.xlu0 %v1083_v58 }
0x1a97   :  { %1476 = vadd.xlane.f32.xlu0 %v1475_v18 }
0x1a9b   :  { %2544 = vadd.xlane.f32.xlu0 %v2543_v17 }
0x1a9f   :  { %3251 = vadd.xlane.f32.xlu0 %v3250_v20 }
0x1aa3   :  { %3644 = vadd.xlane.f32.xlu0 %v3643_v23 }
0x1ae2   :  { %v3905_v28 = vpop.permute.xlu0 %3904 }
0x1ae3   :  { %v3907_v47 = vsel %vm336_vm2, %v3905_v28, 0.0 }
0x1ae4   :  { %3908 = vadd.xlane.f32.xlu1 %v3907_v47 }
0x1afa   :  { %v2168_v52 = vpop.xlane.xlu1 %2167 }
0x1afb   :  { %v2169_v32 = vrot.slane %v2168_v52, 4 }
0x1afd   :  { %v2170_v42 = vadd.f32 %v2169_v32, %v2168_v52 }
0x1afe   :  { %v2561_v43 = vpop.xlane.xlu1 %2560 }
0x1aff   :  { %v2562_v50 = vrot.slane %v2561_v43, 4  ;;  %v2171_v48 = vrot.slane %v2170_v42, 2 }
0x1b01   :  { %v2563_v19 = vadd.f32 %v2562_v50, %v2561_v43  ;;  %v2172_v54 = vadd.f32 %v2171_v48, %v2170_v42 }
0x1b02   :  { %v3629_v29 = vpop.xlane.xlu1 %3628 }
0x1b03   :  { %v3630_v49 = vrot.slane %v3629_v29, 4  ;;  %v2564_v46 = vrot.slane %v2563_v19, 2  ;;  %v2173_v8 = vrot.slane %v2172_v54, 1 }
0x1b05   :  { %v3631_v51 = vadd.f32 %v3630_v49, %v3629_v29  ;;  %v2565_v9 = vadd.f32 %v2564_v46, %v2563_v19  ;;  %v2174_v27 = vadd.f32 %v2173_v8, %v2172_v54 }
0x1b07   :  { %v3632_v62 = vrot.slane %v3631_v51, 2  ;;  %v2566_v56 = vrot.slane %v2565_v9, 1 }
0x1b09   :  { %v3633_v16 = vadd.f32 %v3632_v62, %v3631_v51  ;;  %v2567_v23 = vadd.f32 %v2566_v56, %v2565_v9 }
0x1b0b   :  { %v3634_v28 = vrot.slane %v3633_v16, 1 }
0x1b0d   :  { %v3635_v43 = vadd.f32 %v3634_v28, %v3633_v16 }
0x1b18   :  { %v358_v33 = vpop.xlane.xlu0 %357 }
0x1b19   :  { %v359_v5 = vrot.slane %v358_v33, 4 }
0x1b1b   :  { %v360_v34 = vadd.f32 %v359_v5, %v358_v33 }
0x1b1c   :  { %v1085_v36 = vpop.xlane.xlu0 %1084 }
0x1b1d   :  { %v361_v37 = vrot.slane %v360_v34, 2  ;;  %v1086_v38 = vrot.slane %v1085_v36, 4 }
0x1b1f   :  { %v1087_v39 = vadd.f32 %v1086_v38, %v1085_v36  ;;  %v362_v40 = vadd.f32 %v361_v37, %v360_v34 }
0x1b20   :  { %v1477_v24 = vpop.xlane.xlu0 %1476 }
0x1b21   :  { %v1088_v41 = vrot.slane %v1087_v39, 2  ;;  %v1478_v14 = vrot.slane %v1477_v24, 4  ;;  %v363_v0 = vrot.slane %v362_v40, 1 }
0x1b23   :  { %v1479_v2 = vadd.f32 %v1478_v14, %v1477_v24  ;;  %v364_v44 = vadd.f32 %v363_v0, %v362_v40  ;;  %v1089_v45 = vadd.f32 %v1088_v41, %v1087_v39 }
0x1b24   :  { %v2545_v53 = vpop.xlane.xlu0 %2544 }
0x1b25   :  { %v1480_v55 = vrot.slane %v1479_v2, 2  ;;  %v2546_v57 = vrot.slane %v2545_v53, 4  ;;  %4700 = vpush %v364_v44  ;;  %v1090_v59 = vrot.slane %v1089_v45, 1 }
0x1b27   :  { %v2547_v61 = vadd.f32 %v2546_v57, %v2545_v53  ;;  %v1091_v1 = vadd.f32 %v1090_v59, %v1089_v45  ;;  %v1481_v6 = vadd.f32 %v1480_v55, %v1479_v2 }
0x1b28   :  { %v3252_v63 = vpop.xlane.xlu0 %3251 }
0x1b29   :  { %v2548_v11 = vrot.slane %v2547_v61, 2  ;;  %v3253_v12 = vrot.slane %v3252_v63, 4  ;;  %4702 = vpush %v1091_v1  ;;  %v1482_v13 = vrot.slane %v1481_v6, 1 }
0x1b2a   :  { %4704 = vpush %v1467_v7 }
0x1b2b   :  { %v3254_v15 = vadd.f32 %v3253_v12, %v3252_v63  ;;  %v1483_v60 = vadd.f32 %v1482_v13, %v1481_v6  ;;  %v2549_v35 = vadd.f32 %v2548_v11, %v2547_v61 }
0x1b2c   :  { %v3645_v4 = vpop.xlane.xlu0 %3644 }
0x1b2d   :  { %v3255_v58 = vrot.slane %v3254_v15, 2  ;;  %v3646_v22 = vrot.slane %v3645_v4, 4  ;;  %4706 = vpush %v1483_v60  ;;  %v2550_v18 = vrot.slane %v2549_v35, 1 }
0x1b2e   :  { %4708 = vpush %v2174_v27 }
0x1b2f   :  { %v3647_v17 = vadd.f32 %v3646_v22, %v3645_v4  ;;  %v2551_v20 = vadd.f32 %v2550_v18, %v2549_v35  ;;  %v3256_v21 = vadd.f32 %v3255_v58, %v3254_v15 }
0x1b31   :  { %v3648_v47 = vrot.slane %v3647_v17, 2  ;;  %4710 = vpush %v2551_v20  ;;  %v3257_v25 = vrot.slane %v3256_v21, 1 }
0x1b32   :  { %4712 = vpush %v2567_v23 }
0x1b33   :  { %v3649_v52 = vadd.f32 %v3648_v47, %v3647_v17  ;;  %v3258_v30 = vadd.f32 %v3257_v25, %v3256_v21 }
0x1b35   :  { %4714 = vpush %v3258_v30  ;;  %v3650_v31 = vrot.slane %v3649_v52, 1 }
0x1b36   :  { %4716 = vpush %v3635_v43 }
0x1b37   :  { %v3651_v32 = vadd.f32 %v3650_v31, %v3649_v52 }
0x1b39   :  { %4718 = vpush %v3651_v32 }
0x1b56   :  { %s4701_s28 = spop %4700 }
0x1b57   :  { %367 = sst [smem:[#allocation6]] %s4701_s28 }
0x1b5a   :  { %s4703_s5 = spop %4702 }
0x1b5b   :  { %s1095_s0 = smul.f32 0.125, %s4703_s5  ;;  %s4705_s3 = spop %4704 }
0x1b5c   :  { %s1471_s7 = smul.f32 0.125, %s4705_s3 }
0x1b5d   :  { %1097 = sst [smem:[#allocation2]] %s1095_s0 }
0x1b5e   :  { %1473 = sst [smem:[#allocation4 + $0x1]] %s1471_s7  ;;  %s4707_s19 = spop %4706 }
0x1b5f   :  { %1486 = sst [smem:[#allocation6 + $0x1]] %s4707_s19  ;;  %s4709_s20 = spop %4708 }
0x1b60   :  { %s2178_s12 = smul.f32 0.125, %s4709_s20 }
0x1b62   :  { %2180 = sst [smem:[#allocation2 + $0x1]] %s2178_s12  ;;  %s4711_s30 = spop %4710 }
0x1b63   :  { %s2555_s21 = smul.f32 0.125, %s4711_s30  ;;  %s4713_s1 = spop %4712 }
0x1b64   :  { %2570 = sst [smem:[#allocation6 + $0x2]] %s4713_s1 }
0x1b65   :  { %2557 = sst [smem:[#allocation4 + $0x2]] %s2555_s21 }
0x1b66   :  { %s4715_s22 = spop %4714 }
0x1b67   :  { %s3262_s16 = smul.f32 0.125, %s4715_s22  ;;  %s4717_s10 = spop %4716 }
0x1b68   :  { %s3639_s11 = smul.f32 0.125, %s4717_s10 }
0x1b69   :  { %3264 = sst [smem:[#allocation2 + $0x2]] %s3262_s16 }
0x1b6a   :  { %3641 = sst [smem:[#allocation4 + $0x3]] %s3639_s11  ;;  %s4719_s15 = spop %4718 }
0x1b6b   :  { %3654 = sst [smem:[#allocation6 + $0x3]] %s4719_s15 }
0x1b6c   :  { %3939 = dma.smem_to_hbm %s4784_s13, 16, %s5875_s24, [#allocation5]  }
0x1b6d   :  { %v3909_v33 = vpop.xlane.xlu1 %3908  ;;  %3947 = dma.smem_to_hbm %s4785_s27, 16, %s5876_s25, [#allocation5]  }
0x1b6e   :  { %v3910_v5 = vrot.slane %v3909_v33, 4 }
0x1b70   :  { %v3911_v34 = vadd.f32 %v3910_v5, %v3909_v33 }
0x1b72   :  { %v3912_v3 = vrot.slane %v3911_v34, 2 }
0x1b74   :  { %v3913_v42 = vadd.f32 %v3912_v3, %v3911_v34 }
0x1b76   :  { %v3914_v50 = vrot.slane %v3913_v42, 1 }
0x1b78   :  { %v3915_v36 = vadd.f32 %v3914_v50, %v3913_v42 }
0x1b7a   :  { %4720 = vpush %v3915_v36 }
0x1bab   :  { %s4721_s14 = spop %4720 }
0x1bac   :  { %s3919_s18 = smul.f32 0.125, %s4721_s14 }
0x1bae   :  { %3921 = sst [smem:[#allocation2 + $0x3]] %s3919_s18 }
0x1baf   :  { %3931 = dma.smem_to_hbm %s4786_s6, 16, %s5874_s23, [#allocation3]  }
0x1bb0   :  { %4770 = dma.done.wait [#allocation3], 16  }
0x1bb1   :  { %4771 = vsyncadd [#allocation3], 4294967280 }
0x1bb2   :  { %4772 = dma.done.wait [#allocation5], 32  }
0x1bb3   :  { %4773 = vsyncadd [#allocation5], 4294967264 }
0x1bb4   :  { %3959 = sfence }
0x1bb5   :  { %3960 = vsyncpa [#allocation3], 1 }
0x1bb6   :  { %3961 = vsyncpa [#allocation5], 1 }

</bundles_post_ra>
